<compile_context>
chip_gen: v5e
topology: v5e:2x2
jax: 0.10.0
libtpu: 0.0.40
codegen_flags: <defaults>
</compile_context>

<pallas_src>
import functools
import math

import jax
import jax.numpy as jnp
from jax.experimental import pallas as pl
from jax.experimental.pallas import tpu as pltpu


def _round_up(x, m):
    return (x + m - 1) // m * m


# ---------------------------------------------------------------------------
# Kernel 1: row-tiled MLP path (fc1 -> GELU -> LN -> fc2 -> classifier).
# Outputs: lane-dense padded log-softmax logits, and bf16 row-normalized z.
# ---------------------------------------------------------------------------
def gmlp_mlp_kernel(x_ref, w1_ref, b1_ref, lnw_ref, lnb_ref,
                    w2_ref, b2_ref, wc_ref, bc_ref,
                    logits_ref, zhat_ref, *, nclass):
    # bf16 into the MXU, f32 accumulation.
    x = x_ref[...].astype(jnp.bfloat16)
    w1 = w1_ref[...].astype(jnp.bfloat16)
    h = jnp.dot(x, w1, preferred_element_type=jnp.float32) + b1_ref[...]

    # exact (erf) GELU, matching torch.nn.functional.gelu default
    inv_sqrt2 = jnp.float32(1.0 / math.sqrt(2.0))
    h = 0.5 * h * (1.0 + jax.lax.erf(h * inv_sqrt2))

    # LayerNorm over the feature dim (block = full nhid, so no pad lanes), eps=1e-6
    mu = jnp.mean(h, axis=-1, keepdims=True)
    var = jnp.mean((h - mu) * (h - mu), axis=-1, keepdims=True)
    h = (h - mu) * jax.lax.rsqrt(var + jnp.float32(1e-6))
    h = h * lnw_ref[...] + lnb_ref[...]

    # Dropout: p = 0.0 chosen -> identity in the forward pass.
    # TODO(synk): stochastic dropout (p > 0) would need pltpu.prng_seed/prng_random_bits.

    w2 = w2_ref[...].astype(jnp.bfloat16)
    z = jnp.dot(h.astype(jnp.bfloat16), w2,
                preferred_element_type=jnp.float32) + b2_ref[...]

    # classifier on a 128-multiple padded width; mask pad columns before softmax
    wc = wc_ref[...].astype(jnp.bfloat16)
    logits = jnp.dot(z.astype(jnp.bfloat16), wc,
                     preferred_element_type=jnp.float32) + bc_ref[...]
    col = jax.lax.broadcasted_iota(jnp.int32, logits.shape, 1)
    logits = jnp.where(col < nclass, logits, jnp.float32(-1e30))
    m = jnp.max(logits, axis=-1, keepdims=True)
    shifted = logits - m
    lse = jnp.log(jnp.sum(jnp.exp(shifted), axis=-1, keepdims=True))
    logits_ref[...] = (shifted - lse).astype(logits_ref.dtype)

    # Row-normalize z once here (O(N*nhid)) so the N^2 kernel is a pure matmul.
    # Tiny eps guards degenerate zero-norm rows (reference would produce inf).
    inv_norm = jax.lax.rsqrt(jnp.sum(z * z, axis=-1, keepdims=True)
                             + jnp.float32(1e-12))
    zhat_ref[...] = (z * inv_norm).astype(zhat_ref.dtype)


# ---------------------------------------------------------------------------
# Kernel 2: 2-D tiled cosine-similarity matrix dis = z_hat @ z_hat^T,
# diagonal zeroed only on diagonal tiles. Requires square tiles.
# ---------------------------------------------------------------------------
def gmlp_dis_kernel(zi_ref, zj_ref, dis_ref):
    d = jax.lax.dot_general(
        zi_ref[...], zj_ref[...],
        dimension_numbers=(((1,), (1,)), ((), ())),   # contract last dims: no transpose
        preferred_element_type=jnp.float32)
    dis_ref[...] = d.astype(dis_ref.dtype)

    @pl.when(pl.program_id(0) == pl.program_id(1))
    def _():
        tm, tn = dis_ref.shape
        row = jax.lax.broadcasted_iota(jnp.int32, (tm, tn), 0)
        col = jax.lax.broadcasted_iota(jnp.int32, (tm, tn), 1)
        dis_ref[...] = jnp.where(row == col, jnp.float32(0.0),
                                 dis_ref[...]).astype(dis_ref.dtype)


# ---------------------------------------------------------------------------
# Wrapper
# ---------------------------------------------------------------------------
def gmlp_forward(x, params, *, tile=128):
    """x: [N, nfeat] float32. Returns (log_softmax_logits [N, nclass], x_dis [N, N]).

    tile: square row/col tile (128 default; bump to 256 on v6e/v7x for large N).
    """
    n, nfeat = x.shape
    nhid = params["w1"].shape[1]
    nclass = params["wc"].shape[1]

    n_pad = _round_up(max(n, tile), tile)
    ncls_pad = _round_up(max(nclass, 128), 128)

    # Zero-pad rows of x (sliced back out) and pad the classifier to a
    # lane-dense width (128-multiple) so logits stores are unmasked full vregs.
    x_pad = jnp.zeros((n_pad, nfeat), jnp.float32).at[:n, :].set(x)
    wc_pad = jnp.zeros((nhid, ncls_pad), jnp.float32).at[:, :nclass].set(params["wc"])
    bc_pad = jnp.zeros((1, ncls_pad), jnp.float32).at[:, :nclass].set(params["bc"])

    grid_rows = n_pad // tile
    vmem_limit = 48 * 1024 * 1024   # explicit; fits v7x's 64 MiB physical VMEM

    mlp_call = pl.pallas_call(
        functools.partial(gmlp_mlp_kernel, nclass=nclass),
        out_shape=(
            jax.ShapeDtypeStruct((n_pad, ncls_pad), jnp.float32),
            jax.ShapeDtypeStruct((n_pad, nhid), jnp.bfloat16),
        ),
        grid_spec=pltpu.PrefetchScalarGridSpec(
            num_scalar_prefetch=0,
            grid=(grid_rows,),
            in_specs=[
                pl.BlockSpec((tile, nfeat), lambda i: (i, 0)),     # x row tile
                pl.BlockSpec((nfeat, nhid), lambda i: (0, 0)),     # w1
                pl.BlockSpec((1, nhid), lambda i: (0, 0)),         # b1
                pl.BlockSpec((1, nhid), lambda i: (0, 0)),         # ln_w
                pl.BlockSpec((1, nhid), lambda i: (0, 0)),         # ln_b
                pl.BlockSpec((nhid, nhid), lambda i: (0, 0)),      # w2
                pl.BlockSpec((1, nhid), lambda i: (0, 0)),         # b2
                pl.BlockSpec((nhid, ncls_pad), lambda i: (0, 0)),  # wc (padded)
                pl.BlockSpec((1, ncls_pad), lambda i: (0, 0)),     # bc (padded)
            ],
            out_specs=(
                pl.BlockSpec((tile, ncls_pad), lambda i: (i, 0)),  # logits (lane-dense)
                pl.BlockSpec((tile, nhid), lambda i: (i, 0)),      # z_hat (bf16)
            ),
        ),
        compiler_params=pltpu.CompilerParams(
            dimension_semantics=("parallel",),
            vmem_limit_bytes=vmem_limit,
        ),
        cost_estimate=pl.CostEstimate(
            flops=2 * n_pad * (nfeat * nhid + nhid * nhid + nhid * ncls_pad),
            transcendentals=n_pad * (nhid + ncls_pad),
            bytes_accessed=4 * (n_pad * nfeat + nfeat * nhid + nhid * nhid
                                + nhid * ncls_pad + n_pad * ncls_pad)
                           + 2 * n_pad * nhid,
        ),
    )
    logits_pad, z_hat = mlp_call(
        x_pad,
        params["w1"], params["b1"],
        params["ln_w"], params["ln_b"],
        params["w2"], params["b2"],
        wc_pad, bc_pad,
    )

    dis_call = pl.pallas_call(
        gmlp_dis_kernel,
        out_shape=jax.ShapeDtypeStruct((n_pad, n_pad), jnp.float32),
        grid_spec=pltpu.PrefetchScalarGridSpec(
            num_scalar_prefetch=0,
            grid=(grid_rows, grid_rows),
            in_specs=[
                # i-side block is constant across the fast j axis -> stays resident.
                pl.BlockSpec((tile, nhid), lambda i, j: (i, 0)),
                pl.BlockSpec((tile, nhid), lambda i, j: (j, 0)),
            ],
            out_specs=pl.BlockSpec((tile, tile), lambda i, j: (i, j)),
        ),
        compiler_params=pltpu.CompilerParams(
            dimension_semantics=("parallel", "parallel"),  # shards across v7x's 2 TCs
            vmem_limit_bytes=vmem_limit,
        ),
        cost_estimate=pl.CostEstimate(
            flops=2 * n_pad * n_pad * nhid,
            transcendentals=0,
            bytes_accessed=2 * (2 * n_pad * nhid) + 4 * n_pad * n_pad,
        ),
    )
    x_dis_pad = dis_call(z_hat, z_hat)

    return logits_pad[:n, :nclass], x_dis_pad[:n, :n]


def init_params(key, nfeat, nhid, nclass):
    """Deterministic parameter init mirroring GMLP.__init__ shapes.
    Weights are stored [in_dim, out_dim] (transpose of torch Linear.weight)."""
    k1, k2, k3, k4, k5, k6 = jax.random.split(key, 6)

    def xavier_uniform(k, fan_in, fan_out):
        a = math.sqrt(6.0 / (fan_in + fan_out))
        return jax.random.uniform(k, (fan_in, fan_out), jnp.float32, -a, a)

    def kaiming_linear(kw, kb, fan_in, fan_out):
        bound = math.sqrt(1.0 / fan_in)
        w = jax.random.uniform(kw, (fan_in, fan_out), jnp.float32, -bound, bound)
        b = jax.random.uniform(kb, (1, fan_out), jnp.float32, -bound, bound)
        return w, b

    w1 = xavier_uniform(k1, nfeat, nhid)
    b1 = jax.random.normal(k2, (1, nhid), jnp.float32) * 1e-6
    w2 = xavier_uniform(k3, nhid, nhid)
    b2 = jax.random.normal(k4, (1, nhid), jnp.float32) * 1e-6
    ln_w = jnp.ones((1, nhid), jnp.float32)
    ln_b = jnp.zeros((1, nhid), jnp.float32)
    wc, bc = kaiming_linear(k5, k6, nhid, nclass)
    return dict(w1=w1, b1=b1, w2=w2, b2=b2, ln_w=ln_w, ln_b=ln_b, wc=wc, bc=bc)


if __name__ == "__main__":
    key = jax.random.PRNGKey(0)
    kx, kp = jax.random.split(key)

    # Small but tiling-exercising shapes: 2x1 row grid, 2x2 dis grid.
    N, NFEAT, NHID, NCLASS = 256, 64, 128, 4
    x = jax.random.normal(kx, (N, NFEAT), jnp.float32)
    params = init_params(kp, NFEAT, NHID, NCLASS)

    log_probs, x_dis = gmlp_forward(x, params)
    jax.block_until_ready((log_probs, x_dis))

    assert log_probs.shape == (N, NCLASS)
    assert x_dis.shape == (N, N)
    assert bool(jnp.all(jnp.isfinite(log_probs)))
    assert bool(jnp.all(jnp.isfinite(x_dis)))
    # log_softmax rows must sum (in prob space) to 1; diagonal of x_dis is zero.
    prob_sums = jnp.sum(jnp.exp(log_probs), axis=1)
    assert bool(jnp.allclose(prob_sums, 1.0, atol=1e-3))
    assert bool(jnp.allclose(jnp.diagonal(x_dis), 0.0))
    print("KERNEL_OK")
</pallas_src>

<mosaic_0001>
module attributes {stable_mosaic.version = 11 : i64} {
  func.func @gmlp_mlp_kernel(%arg0: i32, %arg1: memref<128x64xf32, #tpu.memory_space<vmem>>, %arg2: memref<64x128xf32, #tpu.memory_space<vmem>>, %arg3: memref<1x128xf32, #tpu.memory_space<vmem>>, %arg4: memref<1x128xf32, #tpu.memory_space<vmem>>, %arg5: memref<1x128xf32, #tpu.memory_space<vmem>>, %arg6: memref<128x128xf32, #tpu.memory_space<vmem>>, %arg7: memref<1x128xf32, #tpu.memory_space<vmem>>, %arg8: memref<128x128xf32, #tpu.memory_space<vmem>>, %arg9: memref<1x128xf32, #tpu.memory_space<vmem>>, %arg10: memref<128x128xf32, #tpu.memory_space<vmem>>, %arg11: memref<128x128xbf16, #tpu.memory_space<vmem>>) attributes {dimension_semantics = [#tpu.dimension_semantics<parallel>], iteration_bounds = array<i64: 2>, scalar_prefetch = 0 : i64, scratch_operands = 0 : i64, tpu.core_type = #tpu.core_type<tc>, window_params = [{transform_indices = @transform_0, window_bounds = array<i64: 128, 64>}, {pipeline_mode = #tpu.pipeline_mode<synchronous>, transform_indices = @transform_1, window_bounds = array<i64: 64, 128>}, {pipeline_mode = #tpu.pipeline_mode<synchronous>, transform_indices = @transform_2, window_bounds = array<i64: 1, 128>}, {pipeline_mode = #tpu.pipeline_mode<synchronous>, transform_indices = @transform_3, window_bounds = array<i64: 1, 128>}, {pipeline_mode = #tpu.pipeline_mode<synchronous>, transform_indices = @transform_4, window_bounds = array<i64: 1, 128>}, {pipeline_mode = #tpu.pipeline_mode<synchronous>, transform_indices = @transform_5, window_bounds = array<i64: 128, 128>}, {pipeline_mode = #tpu.pipeline_mode<synchronous>, transform_indices = @transform_6, window_bounds = array<i64: 1, 128>}, {pipeline_mode = #tpu.pipeline_mode<synchronous>, transform_indices = @transform_7, window_bounds = array<i64: 128, 128>}, {pipeline_mode = #tpu.pipeline_mode<synchronous>, transform_indices = @transform_8, window_bounds = array<i64: 1, 128>}, {transform_indices = @transform_9, window_bounds = array<i64: 128, 128>}, {transform_indices = @transform_10, window_bounds = array<i64: 128, 128>}]} {
    %c0 = arith.constant 0 : index
    %c0_0 = arith.constant 0 : index
    %0 = vector.load %arg1[%c0, %c0_0] : memref<128x64xf32, #tpu.memory_space<vmem>>, vector<128x64xf32>
    %1 = arith.truncf %0 : vector<128x64xf32> to vector<128x64xbf16>
    %c0_1 = arith.constant 0 : index
    %c0_2 = arith.constant 0 : index
    %2 = vector.load %arg2[%c0_1, %c0_2] : memref<64x128xf32, #tpu.memory_space<vmem>>, vector<64x128xf32>
    %3 = arith.truncf %2 : vector<64x128xf32> to vector<64x128xbf16>
    %cst = arith.constant dense<0.000000e+00> : vector<128x128xf32>
    %4 = tpu.matmul %1, %3, %cst {dimension_numbers = #tpu.dot_dimension_numbers<[1], [0], [0], [1], [0, 0, 1, 1], [], []>} : vector<128x64xbf16>, vector<64x128xbf16>, vector<128x128xf32> -> vector<128x128xf32>
    %c0_3 = arith.constant 0 : index
    %c0_4 = arith.constant 0 : index
    %5 = vector.load %arg3[%c0_3, %c0_4] : memref<1x128xf32, #tpu.memory_space<vmem>>, vector<1x128xf32>
    %6 = vector.broadcast %5 : vector<1x128xf32> to vector<128x128xf32>
    %7 = arith.addf %4, %6 : vector<128x128xf32>
    %cst_5 = arith.constant 5.000000e-01 : f32
    %8 = vector.broadcast %cst_5 : f32 to vector<128x128xf32>
    %9 = arith.mulf %8, %7 : vector<128x128xf32>
    %cst_6 = arith.constant 0.707106769 : f32
    %10 = vector.broadcast %cst_6 : f32 to vector<128x128xf32>
    %11 = arith.mulf %7, %10 : vector<128x128xf32>
    %12 = math.erf %11 : vector<128x128xf32>
    %cst_7 = arith.constant 1.000000e+00 : f32
    %13 = vector.broadcast %cst_7 : f32 to vector<128x128xf32>
    %14 = arith.addf %13, %12 : vector<128x128xf32>
    %15 = arith.mulf %9, %14 : vector<128x128xf32>
    %cst_8 = arith.constant dense<0.000000e+00> : vector<128xf32>
    %16 = vector.multi_reduction <add>, %15, %cst_8 [1] : vector<128x128xf32> to vector<128xf32>
    %17 = vector.shape_cast %16 : vector<128xf32> to vector<128x1xf32>
    %cst_9 = arith.constant 1.280000e+02 : f32
    %18 = vector.broadcast %cst_9 : f32 to vector<128x1xf32>
    %19 = arith.divf %17, %18 : vector<128x1xf32>
    %20 = vector.broadcast %19 : vector<128x1xf32> to vector<128x128xf32>
    %21 = arith.subf %15, %20 : vector<128x128xf32>
    %22 = vector.broadcast %19 : vector<128x1xf32> to vector<128x128xf32>
    %23 = arith.subf %15, %22 : vector<128x128xf32>
    %24 = arith.mulf %21, %23 : vector<128x128xf32>
    %cst_10 = arith.constant dense<0.000000e+00> : vector<128xf32>
    %25 = vector.multi_reduction <add>, %24, %cst_10 [1] : vector<128x128xf32> to vector<128xf32>
    %26 = vector.shape_cast %25 : vector<128xf32> to vector<128x1xf32>
    %cst_11 = arith.constant 1.280000e+02 : f32
    %27 = vector.broadcast %cst_11 : f32 to vector<128x1xf32>
    %28 = arith.divf %26, %27 : vector<128x1xf32>
    %29 = vector.broadcast %19 : vector<128x1xf32> to vector<128x128xf32>
    %30 = arith.subf %15, %29 : vector<128x128xf32>
    %cst_12 = arith.constant 9.99999997E-7 : f32
    %31 = vector.broadcast %cst_12 : f32 to vector<128x1xf32>
    %32 = arith.addf %28, %31 : vector<128x1xf32>
    %33 = math.rsqrt %32 : vector<128x1xf32>
    %34 = vector.broadcast %33 : vector<128x1xf32> to vector<128x128xf32>
    %35 = arith.mulf %30, %34 : vector<128x128xf32>
    %c0_13 = arith.constant 0 : index
    %c0_14 = arith.constant 0 : index
    %36 = vector.load %arg4[%c0_13, %c0_14] : memref<1x128xf32, #tpu.memory_space<vmem>>, vector<1x128xf32>
    %37 = vector.broadcast %36 : vector<1x128xf32> to vector<128x128xf32>
    %38 = arith.mulf %35, %37 : vector<128x128xf32>
    %c0_15 = arith.constant 0 : index
    %c0_16 = arith.constant 0 : index
    %39 = vector.load %arg5[%c0_15, %c0_16] : memref<1x128xf32, #tpu.memory_space<vmem>>, vector<1x128xf32>
    %40 = vector.broadcast %39 : vector<1x128xf32> to vector<128x128xf32>
    %41 = arith.addf %38, %40 : vector<128x128xf32>
    %c0_17 = arith.constant 0 : index
    %c0_18 = arith.constant 0 : index
    %42 = vector.load %arg6[%c0_17, %c0_18] : memref<128x128xf32, #tpu.memory_space<vmem>>, vector<128x128xf32>
    %43 = arith.truncf %42 : vector<128x128xf32> to vector<128x128xbf16>
    %44 = arith.truncf %41 : vector<128x128xf32> to vector<128x128xbf16>
    %cst_19 = arith.constant dense<0.000000e+00> : vector<128x128xf32>
    %45 = tpu.matmul %44, %43, %cst_19 {dimension_numbers = #tpu.dot_dimension_numbers<[1], [0], [0], [1], [0, 0, 1, 1], [], []>} : vector<128x128xbf16>, vector<128x128xbf16>, vector<128x128xf32> -> vector<128x128xf32>
    %c0_20 = arith.constant 0 : index
    %c0_21 = arith.constant 0 : index
    %46 = vector.load %arg7[%c0_20, %c0_21] : memref<1x128xf32, #tpu.memory_space<vmem>>, vector<1x128xf32>
    %47 = vector.broadcast %46 : vector<1x128xf32> to vector<128x128xf32>
    %48 = arith.addf %45, %47 : vector<128x128xf32>
    %c0_22 = arith.constant 0 : index
    %c0_23 = arith.constant 0 : index
    %49 = vector.load %arg8[%c0_22, %c0_23] : memref<128x128xf32, #tpu.memory_space<vmem>>, vector<128x128xf32>
    %50 = arith.truncf %49 : vector<128x128xf32> to vector<128x128xbf16>
    %51 = arith.truncf %48 : vector<128x128xf32> to vector<128x128xbf16>
    %cst_24 = arith.constant dense<0.000000e+00> : vector<128x128xf32>
    %52 = tpu.matmul %51, %50, %cst_24 {dimension_numbers = #tpu.dot_dimension_numbers<[1], [0], [0], [1], [0, 0, 1, 1], [], []>} : vector<128x128xbf16>, vector<128x128xbf16>, vector<128x128xf32> -> vector<128x128xf32>
    %c0_25 = arith.constant 0 : index
    %c0_26 = arith.constant 0 : index
    %53 = vector.load %arg9[%c0_25, %c0_26] : memref<1x128xf32, #tpu.memory_space<vmem>>, vector<1x128xf32>
    %54 = vector.broadcast %53 : vector<1x128xf32> to vector<128x128xf32>
    %55 = arith.addf %52, %54 : vector<128x128xf32>
    %56 = tpu.iota {dimensions = array<i32: 1>} : vector<128x128xi32>
    %c4_i32 = arith.constant 4 : i32
    %57 = vector.broadcast %c4_i32 : i32 to vector<128x128xi32>
    %58 = arith.cmpi slt, %56, %57 : vector<128x128xi32>
    %cst_27 = arith.constant -1.000000e+30 : f32
    %59 = vector.broadcast %cst_27 : f32 to vector<128x128xf32>
    %60 = arith.select %58, %55, %59 : vector<128x128xi1>, vector<128x128xf32>
    %cst_28 = arith.constant dense<0xFF800000> : vector<128xf32>
    %61 = vector.multi_reduction <maximumf>, %60, %cst_28 [1] : vector<128x128xf32> to vector<128xf32>
    %62 = vector.shape_cast %61 : vector<128xf32> to vector<128x1xf32>
    %63 = vector.broadcast %62 : vector<128x1xf32> to vector<128x128xf32>
    %64 = arith.subf %60, %63 : vector<128x128xf32>
    %65 = math.exp %64 : vector<128x128xf32>
    %cst_29 = arith.constant dense<0.000000e+00> : vector<128xf32>
    %66 = vector.multi_reduction <add>, %65, %cst_29 [1] : vector<128x128xf32> to vector<128xf32>
    %67 = vector.shape_cast %66 : vector<128xf32> to vector<128x1xf32>
    %68 = math.log %67 : vector<128x1xf32>
    %69 = vector.broadcast %68 : vector<128x1xf32> to vector<128x128xf32>
    %70 = arith.subf %64, %69 : vector<128x128xf32>
    %c0_30 = arith.constant 0 : index
    %c0_31 = arith.constant 0 : index
    %71 = vector.load %arg10[%c0_30, %c0_31] : memref<128x128xf32, #tpu.memory_space<vmem>>, vector<128x128xf32>
    tpu.vector_store %arg10[%c0_30, %c0_31], %70 {strides = array<i32>} : memref<128x128xf32, #tpu.memory_space<vmem>>, vector<128x128xf32>,
    %72 = arith.mulf %48, %48 : vector<128x128xf32>
    %cst_32 = arith.constant dense<0.000000e+00> : vector<128xf32>
    %73 = vector.multi_reduction <add>, %72, %cst_32 [1] : vector<128x128xf32> to vector<128xf32>
    %74 = vector.shape_cast %73 : vector<128xf32> to vector<128x1xf32>
    %cst_33 = arith.constant 9.99999996E-13 : f32
    %75 = vector.broadcast %cst_33 : f32 to vector<128x1xf32>
    %76 = arith.addf %74, %75 : vector<128x1xf32>
    %77 = math.rsqrt %76 : vector<128x1xf32>
    %78 = vector.broadcast %77 : vector<128x1xf32> to vector<128x128xf32>
    %79 = arith.mulf %48, %78 : vector<128x128xf32>
    %80 = arith.truncf %79 : vector<128x128xf32> to vector<128x128xbf16>
    %c0_34 = arith.constant 0 : index
    %c0_35 = arith.constant 0 : index
    %81 = vector.load %arg11[%c0_34, %c0_35] : memref<128x128xbf16, #tpu.memory_space<vmem>>, vector<128x128xbf16>
    tpu.vector_store %arg11[%c0_34, %c0_35], %80 {strides = array<i32>} : memref<128x128xbf16, #tpu.memory_space<vmem>>, vector<128x128xbf16>,
    return
  }
  func.func @transform_0(%arg0: i32) -> (i32, i32) {
    %c0_i32 = arith.constant 0 : i32
    %c0_i32_0 = arith.constant 0 : i32
    return %arg0, %c0_i32 : i32, i32
  }
  func.func @transform_1(%arg0: i32) -> (i32, i32) {
    %c0_i32 = arith.constant 0 : i32
    %c0_i32_0 = arith.constant 0 : i32
    %c0_i32_1 = arith.constant 0 : i32
    return %c0_i32, %c0_i32_0 : i32, i32
  }
  func.func @transform_2(%arg0: i32) -> (i32, i32) {
    %c0_i32 = arith.constant 0 : i32
    %c0_i32_0 = arith.constant 0 : i32
    %c0_i32_1 = arith.constant 0 : i32
    return %c0_i32, %c0_i32_0 : i32, i32
  }
  func.func @transform_3(%arg0: i32) -> (i32, i32) {
    %c0_i32 = arith.constant 0 : i32
    %c0_i32_0 = arith.constant 0 : i32
    %c0_i32_1 = arith.constant 0 : i32
    return %c0_i32, %c0_i32_0 : i32, i32
  }
  func.func @transform_4(%arg0: i32) -> (i32, i32) {
    %c0_i32 = arith.constant 0 : i32
    %c0_i32_0 = arith.constant 0 : i32
    %c0_i32_1 = arith.constant 0 : i32
    return %c0_i32, %c0_i32_0 : i32, i32
  }
  func.func @transform_5(%arg0: i32) -> (i32, i32) {
    %c0_i32 = arith.constant 0 : i32
    %c0_i32_0 = arith.constant 0 : i32
    %c0_i32_1 = arith.constant 0 : i32
    return %c0_i32, %c0_i32_0 : i32, i32
  }
  func.func @transform_6(%arg0: i32) -> (i32, i32) {
    %c0_i32 = arith.constant 0 : i32
    %c0_i32_0 = arith.constant 0 : i32
    %c0_i32_1 = arith.constant 0 : i32
    return %c0_i32, %c0_i32_0 : i32, i32
  }
  func.func @transform_7(%arg0: i32) -> (i32, i32) {
    %c0_i32 = arith.constant 0 : i32
    %c0_i32_0 = arith.constant 0 : i32
    %c0_i32_1 = arith.constant 0 : i32
    return %c0_i32, %c0_i32_0 : i32, i32
  }
  func.func @transform_8(%arg0: i32) -> (i32, i32) {
    %c0_i32 = arith.constant 0 : i32
    %c0_i32_0 = arith.constant 0 : i32
    %c0_i32_1 = arith.constant 0 : i32
    return %c0_i32, %c0_i32_0 : i32, i32
  }
  func.func @transform_9(%arg0: i32) -> (i32, i32) {
    %c0_i32 = arith.constant 0 : i32
    %c0_i32_0 = arith.constant 0 : i32
    return %arg0, %c0_i32 : i32, i32
  }
  func.func @transform_10(%arg0: i32) -> (i32, i32) {
    %c0_i32 = arith.constant 0 : i32
    %c0_i32_0 = arith.constant 0 : i32
    return %arg0, %c0_i32 : i32, i32
  }
}

</mosaic_0001>

<bundles_post_ra>
// kernel: tpu_custom_call.1
= control target key start
LH: loop header
LB: loop body
LE: loop exit
PB: predicated region body
PF: predicated region fallthrough
CT: control target
= control target key end

     0   :  { %s4337_s0 = inlined_call_operand.vmem [shape: f32[256,64], index: 0, kind: input, shape index: {}]   ;;  %s4338_s1 = inlined_call_operand.vmem [shape: f32[64,128], index: 1, kind: input, shape index: {}]   ;;  %s4339_s2 = inlined_call_operand.vmem [shape: f32[1,128], index: 2, kind: input, shape index: {}]   ;;  %s4340_s3 = inlined_call_operand.vmem [shape: f32[1,128], index: 3, kind: input, shape index: {}]   ;;  %s4341_s4 = inlined_call_operand.vmem [shape: f32[1,128], index: 4, kind: input, shape index: {}]   ;;  %s4342_s5 = inlined_call_operand.vmem [shape: f32[128,128], index: 5, kind: input, shape index: {}]   ;;  %s4343_s6 = inlined_call_operand.vmem [shape: f32[1,128], index: 6, kind: input, shape index: {}]   ;;  %s4344_s7 = inlined_call_operand.vmem [shape: f32[128,128], index: 7, kind: input, shape index: {}]   ;;  %s4345_s8 = inlined_call_operand.vmem [shape: f32[1,128], index: 8, kind: input, shape index: {}]   ;;  %s4346_s9 = inlined_call_operand.hbm [shape: f32[256,128], index: 9, kind: output, shape index: {0}]   ;;  %s4347_s10 = inlined_call_operand.hbm [shape: bf16[256,128], index: 10, kind: output, shape index: {1}]  }
   0x1   :  { %4348 = sst [smem:[#allocation9_spill]] %s4337_s0 }
   0x2   :  { %4349 = sst [smem:[#allocation10_spill]] %s4338_s1 }
   0x3   :  { %16 = vsyncpa [#allocation3], 0 }
   0x4   :  { %18 = vsyncpa [#allocation3 + $0x1], 0 }
   0x5   :  { %19 = vsyncpa [#allocation5], 0 }
   0x6   :  { %21 = vsyncpa [#allocation5 + $0x1], 0  ;;  %s2806_s13 = smov 0   ;;  %s2808_s14 = smov 0  }
   0x7   :  { %s2810_s15 = smov 0   ;;  %s2812_s16 = smov 0  }
   0x8 LB: > { %s2827_s17 = sadd.s32 4294967295, %s2744_s16   ;;  %s2329_s18 = sadd.s32 4294967294, %s2744_s16   ;;  %s2744_s16 = sphi %s2812_s16, %s4381_s16   ;;  %s2740_s15 = sphi %s2810_s15, %s4380_s15   ;;  %s2736_s14 = sphi %s2808_s14, %s4379_s14   ;;  %s2732_s13 = sphi %s2806_s13, %s4378_s13  }
   0x9   : > { %s2831_s19 = sadd.s32 1, %s2744_s16   ;;  %s228_s20 = sadd.s32 1, %s2740_s15 }
   0xa   : > { %s225_s21 = ssub.s32 %s2744_s16, %s2831_s19  ;;  %p238_p0 = scmp.ne.s32.totalorder %s2740_s15, %s2736_s14 }
   0xb   : > { %p226_p1 = scmp.eq.s32.totalorder %s225_s21, 0  ;;  %p239_p2 = scmp.eq.s32.totalorder %s2827_s17, 1 }
   0xc   : > { %p244_p3 = scmp.ne.s32.totalorder %s2736_s14, %s2732_s13  ;;  %p245_p4 = scmp.eq.s32.totalorder %s2329_s18, 1 }
   0xd   : > { %s2842_s22 = scalar_select %p226_p1, %s2740_s15, %s228_s20  }
   0xe   : > { %p2844_p5 = por %p239_p2, %p238_p0  ;;  %p2848_p6 = por %p245_p4, %p244_p3 }
   0xf   : > { %4350 = sst [smem:[#allocation8_spill]] %s2842_s22  ;;  %p2332_p7 = scmp.ge.s32.totalorder %s2744_s16, 1 }
  0x10   : > { %p322_p8 = scmp.lt.s32.totalorder %s2744_s16, 3 }
  0x12   : > { %p323_p9 = pnand %p2332_p7, %p322_p8 }
  0x13   : > { %s4353_s1 = sld [smem:[#allocation10_spill]] (!%p323_p9)  ;;  %s2335_s11 = sshll.u32 (!%p323_p9), %s2827_s17, 4 }
  0x14   : > { %326 = sbr.rel (%p323_p9) target bundleno = 1209 (0x4b9), region = 56  ;;  %p366_p10 = scmp.lt.s32.totalorder (!%p323_p9), %s2335_s11, 31 }
  0x15   : > { %s4354_s0 = sld [smem:[#allocation9_spill]] (!%p323_p9)  ;;  %s3926_s22 = sand.u32 (!%p323_p9), 1, %s2736_s14  }
  0x16   : > { %s2370_s28 = sshll.u32 (!%p323_p9), %s2827_s17, 6  ;;  %s2202_s21 = scalar_lea.sflag (!%p323_p9), [#allocation5], %s3926_s22 }
  0x17   : > { %s2230_s18 = scalar_lea.hbm (!%p323_p9), %s4347_s10, %s2370_s28  ;;  %s2670_s12 = scalar_lea.hbm (!%p323_p9), %s4347_s10, 128 }
  0x19   : > { %v404_v0 = vld [vmem:[%s4353_s1 + $0x30] sm:$0xff]  ;;  %v405_v1 = vld [vmem:[%s4353_s1 + $0x38] sm:$0xff]  ;;  %v402_v2 = vld [vmem:[%s4353_s1 + $0x20] sm:$0xff]  ;;  %s4383_s11 = smov (!%p366_p10, %s2335_s11), 31  ;;  %vm414_vm0 = vcmask 523264  }
  0x1a   : > { %v409_v3 = vpack.c.bf16 %v405_v1, %v404_v0  ;;  %v403_v4 = vld [vmem:[%s4353_s1 + $0x28] sm:$0xff]  ;;  %v400_v6 = vld [vmem:[%s4353_s1 + $0x10] sm:$0xff]  ;;  %v401_v7 = vld [vmem:[%s4353_s1 + $0x18] sm:$0xff]  ;;  %s2336_s27 = sshll.u32 %s4383_s11, 3  ;;  %s2334_s11 = sshll.u32 %s3926_s22, 6 }
  0x1b   : > { %v408_v5 = vpack.c.bf16 %v403_v4, %v402_v2  ;;  %v407_v8 = vpack.c.bf16 %v401_v7, %v400_v6  ;;  %v398_v9 = vld [vmem:[%s4353_s1] sm:$0xff]  ;;  %v399_v10 = vld [vmem:[%s4353_s1 + $0x8] sm:$0xff]  ;;  %s2882_s20 = scalar_lea.vmem %s4354_s0, %s2336_s27  ;;  %s3941_s26 = scalar_lea.vmem [#allocation4], %s2334_s11 }
  0x1c   : > { %443 = vmatpush.bf16.msra.mxu0 %v409_v3  ;;  %v406_v11 = vpack.c.bf16 %v399_v10, %v398_v9  ;;  %v374_v12 = vld [vmem:[%s2882_s20] sm:$0xff]  ;;  %v375_v13 = vld [vmem:[%s2882_s20 + $0x8] sm:$0xff]  ;;  %v376_v15 = vld [vmem:[%s2882_s20 + $0x10] sm:$0xff]  ;;  %s2333_s27 = sshll.u32 %s3926_s22, 7  ;;  %s2233_s11 = sshll.u32 %s2230_s18, 4  ;;  %s2234_s11 = int_to_ptr.hbm [resolvable:$true] %s2233_s11 }
  0x1d   : > { %v390_v14 = vpack.c.bf16 %v375_v13, %v374_v12  ;;  %v377_v16 = vld [vmem:[%s2882_s20 + $0x18] sm:$0xff]  ;;  %v378_v18 = vld [vmem:[%s2882_s20 + $0x20] sm:$0xff]  ;;  %v379_v19 = vld [vmem:[%s2882_s20 + $0x28] sm:$0xff]  ;;  %s4253_s29 = scalar_lea.vmem [#allocation2], %s2333_s27  ;;  %s2664_s25 = sshra.s32 %s2234_s11, 4  ;;  %s2665_s25 = int_to_ptr.hbm [resolvable:$true] %s2664_s25 }
  0x1e   : > { %v391_v17 = vpack.c.bf16 %v377_v16, %v376_v15  ;;  %v392_v20 = vpack.c.bf16 %v379_v19, %v378_v18  ;;  %v380_v21 = vld [vmem:[%s2882_s20 + $0x30] sm:$0xff]  ;;  %v381_v22 = vld [vmem:[%s2882_s20 + $0x38] sm:$0xff]  ;;  %v382_v24 = vld [vmem:[%s2882_s20 + $0x40] sm:$0xff]  ;;  %s2666_s27 = scalar_lea.hbm %s2665_s25, 64  ;;  %p2671_p0 = scmp.lt.s32.totalorder %s2665_s25, %s4347_s10 }
  0x1f   : > { %v393_v23 = vpack.c.bf16 %v381_v22, %v380_v21  ;;  %v383_v25 = vld [vmem:[%s2882_s20 + $0x48] sm:$0xff]  ;;  %v384_v27 = vld [vmem:[%s2882_s20 + $0x50] sm:$0xff]  ;;  %v385_v28 = vld [vmem:[%s2882_s20 + $0x58] sm:$0xff]  ;;  %p2667_p11 = scmp.ne.s32.totalorder %s2665_s25, %s2666_s27  ;;  %p2672_p1 = scmp.lt.s32.totalorder %s2670_s12, %s2666_s27 }
  0x20   : > { %444 = vmatpush.bf16.msra.mxu0 %v408_v5  ;;  %v394_v26 = vpack.c.bf16 %v383_v25, %v382_v24  ;;  %v395_v29 = vpack.c.bf16 %v385_v28, %v384_v27  ;;  %v386_v30 = vld [vmem:[%s2882_s20 + $0x60] sm:$0xff]  ;;  %v387_v31 = vld [vmem:[%s2882_s20 + $0x68] sm:$0xff]  ;;  %v388_v33 = vld [vmem:[%s2882_s20 + $0x70] sm:$0xff] }
  0x21   : > { %v396_v32 = vpack.c.bf16 %v387_v31, %v386_v30  ;;  %v389_v34 = vld [vmem:[%s2882_s20 + $0x78] sm:$0xff]  ;;  %v2911_v36 = vld [vmem:[%s4339_s2] ss:$0 sm:$0xff]  ;;  %s2231_s20 = sshll.u32 %s3941_s26, 4  ;;  %p2668_p12 = pnand %p2667_p11, %p2844_p5  ;;  %s2232_s20 = int_to_ptr.vmem [resolvable:$true] %s2231_s20 }
  0x22   : > { %v397_v35 = vpack.c.bf16 %v389_v34, %v388_v33  ;;  %p2673_p2 = por %p2672_p1, %p2671_p0 }
  0x23   : > { %p2669_p13 = pneg %p2668_p12 }
  0x24   : > { %445 = vmatpush.bf16.msra.mxu0 %v407_v8 }
  0x25   : > { %p2674_p3 = pnand %p2673_p2, %p2669_p13 }
  0x28   : > { %446 = vmatpush.bf16.msra.mxu0 %v406_v11 }
  0x2b   : > { %2337 = vmatmul.msk.bf16.vlgmr.msra.gmra.mxu0 %vm414_vm0, %v390_v14 }
  0x3b   : > { %2338 = vmatmul.msk.bf16.gmra.mxu0 %vm414_vm0, %v391_v17 }
  0x4b   : > { %2339 = vmatmul.msk.bf16.gmra.mxu0 %vm414_vm0, %v392_v20 }
  0x5b   : > { %2340 = vmatmul.msk.bf16.gmra.mxu0 %vm414_vm0, %v393_v23 }
  0x6b   : > { %2341 = vmatmul.msk.bf16.gmra.mxu0 %vm414_vm0, %v394_v26 }
  0x7b   : > { %2342 = vmatmul.msk.bf16.gmra.mxu0 %vm414_vm0, %v395_v29 }
  0x8b   : > { %2343 = vmatmul.msk.bf16.gmra.mxu0 %vm414_vm0, %v396_v32 }
  0x9b   : > { %2344 = vmatmul.msk.bf16.gmra.mxu0 %vm414_vm0, %v397_v35 }
  0xa8   : > { %v448_v37 = vpop.f32.mrf.mxu0 }
  0xa9   : > { %v2914_v38 = vadd.f32 %v2911_v36, %v448_v37 }
  0xab   : > { %v2917_v39 = vmul.f32 0.70710677, %v2914_v38 }
  0xad   : > { %v520_v40 = vmul.f32 %v2917_v39, %v2917_v39 }
  0xaf   : > { %v521_v41 = vmin.f32 %v520_v40, 16.0 }
  0xb0   : > { %v450_v42 = vpop.f32.mrf.mxu0 }
  0xb1   : > { %v522_v43 = vmul.f32 2.1237322e-06, %v521_v41  ;;  %v2922_v44 = vadd.f32 %v2911_v36, %v450_v42  ;;  %v533_v45 = vmul.f32 3.8918573e-05, %v521_v41 }
  0xb3   : > { %v523_v46 = vadd.f32 0.00028619796, %v522_v43  ;;  %v2925_v47 = vmul.f32 0.70710677, %v2922_v44  ;;  %v534_v48 = vadd.f32 0.001143296, %v533_v45 }
  0xb5   : > { %v524_v49 = vmul.f32 %v523_v46, %v521_v41  ;;  %v560_v50 = vmul.f32 %v2925_v47, %v2925_v47  ;;  %v535_v51 = vmul.f32 %v534_v48, %v521_v41 }
  0xb7   : > { %v525_v52 = vadd.f32 0.0036580483, %v524_v49  ;;  %v2929_v53 = vmin.f32 %v560_v50, 16.0  ;;  %v536_v55 = vadd.f32 0.014752088, %v535_v51 }
  0xb8   : > { %v453_v54 = vpop.f32.mrf.mxu0 }
  0xb9   : > { %v562_v56 = vmul.f32 2.1237322e-06, %v2929_v53  ;;  %v2933_v57 = vadd.f32 %v2911_v36, %v453_v54  ;;  %v573_v58 = vmul.f32 3.8918573e-05, %v2929_v53  ;;  %v537_v59 = vmul.f32 %v536_v55, %v521_v41 }
  0xba   : > { %v526_v60 = vmul.f32 %v525_v52, %v521_v41 }
  0xbb   : > { %v563_v61 = vadd.f32 0.00028619796, %v562_v56  ;;  %v2937_v62 = vmul.f32 0.70710677, %v2933_v57  ;;  %v538_v63 = vadd.f32 0.112945676, %v537_v59 }
  0xbc   : > { %v574_v0 = vadd.f32 0.001143296, %v573_v58  ;;  %v527_v5 = vadd.f32 0.05243302, %v526_v60 }
  0xbd   : > { %v564_v1 = vmul.f32 %v563_v61, %v2929_v53  ;;  %v600_v2 = vmul.f32 %v2937_v62, %v2937_v62  ;;  %v539_v3 = vmul.f32 %v538_v63, %v521_v41 }
  0xbe   : > { %v575_v4 = vmul.f32 %v574_v0, %v2929_v53  ;;  %v528_v16 = vmul.f32 %v527_v5, %v521_v41 }
  0xbf   : > { %v2943_v6 = vmin.f32 %v600_v2, 16.0  ;;  %v540_v8 = vadd.f32 0.4994258, %v539_v3  ;;  %v565_v10 = vadd.f32 0.0036580483, %v564_v1 }
  0xc0   : > { %v455_v7 = vpop.f32.mrf.mxu0  ;;  %v576_v9 = vadd.f32 0.014752088, %v575_v4  ;;  %v529_v26 = vadd.f32 0.18741608, %v528_v16 }
  0xc1   : > { %v2946_v11 = vadd.f32 %v2911_v36, %v455_v7  ;;  %v602_v12 = vmul.f32 2.1237322e-06, %v2943_v6  ;;  %v541_v13 = vmul.f32 %v540_v8, %v521_v41  ;;  %v613_v15 = vmul.f32 3.8918573e-05, %v2943_v6 }
  0xc2   : > { %v577_v14 = vmul.f32 %v576_v9, %v2929_v53  ;;  %v566_v20 = vmul.f32 %v565_v10, %v2929_v53  ;;  %v530_v37 = vmul.f32 %v529_v26, %v521_v41 }
  0xc3   : > { %v603_v17 = vadd.f32 0.00028619796, %v602_v12  ;;  %v2952_v18 = vmul.f32 0.70710677, %v2946_v11  ;;  %v542_v19 = vadd.f32 1.0, %v541_v13 }
  0xc4   : > { %v578_v21 = vadd.f32 0.112945676, %v577_v14  ;;  %v614_v22 = vadd.f32 0.001143296, %v613_v15  ;;  %v567_v29 = vadd.f32 0.05243302, %v566_v20 }
  0xc5   : > { %v604_v23 = vmul.f32 %v603_v17, %v2943_v6  ;;  %2488 = vrcp.f32 %v542_v19  ;;  %v640_v24 = vmul.f32 %v2952_v18, %v2952_v18  ;;  %v531_v54 = vadd.f32 1.1283791, %v530_v37 }
  0xc6   : > { %v579_v25 = vmul.f32 %v578_v21, %v2929_v53  ;;  %v615_v28 = vmul.f32 %v614_v22, %v2943_v6  ;;  %v568_v46 = vmul.f32 %v567_v29, %v2929_v53  ;;  %v552_v55 = vand.u32 2147483647, %v542_v19 }
  0xc7   : > { %v605_v31 = vadd.f32 0.0036580483, %v604_v23  ;;  %v2963_v34 = vmin.f32 %v640_v24, 16.0  ;;  %v554_v56 = vand.u32 2147483648, %v542_v19  ;;  %vm548_vm2 = vweird.f32 %v542_v19 }
  0xc8   : > { %v458_v27 = vpop.f32.mrf.mxu0  ;;  %v580_v32 = vadd.f32 0.4994258, %v579_v25  ;;  %v616_v33 = vadd.f32 0.014752088, %v615_v28  ;;  %v569_v61 = vadd.f32 0.18741608, %v568_v46  ;;  %v532_v4 = vmul.f32 %v531_v54, %v2917_v39 }
  0xc9   : > { %v2961_v30 = vadd.f32 %v2911_v36, %v458_v27  ;;  %v606_v48 = vmul.f32 %v605_v31, %v2943_v6  ;;  %v642_v51 = vmul.f32 2.1237322e-06, %v2963_v34  ;;  %v653_v1 = vmul.f32 3.8918573e-05, %v2963_v34 }
  0xca   : > { %v581_v40 = vmul.f32 %v580_v32, %v2929_v53  ;;  %v617_v42 = vmul.f32 %v616_v33, %v2943_v6  ;;  %vm553_vm4 = vcmp.eq.f32.partialorder %v552_v55, 8.507059e+37  ;;  %v555_v5 = vor.u32 1.1754944e-38, %v554_v56 }
  0xcb   : > { %v2489_v35 = vpop.eup %2488  ;;  %v2968_v43 = vmul.f32 0.70710677, %v2961_v30  ;;  %v607_v63 = vadd.f32 0.05243302, %v606_v48  ;;  %v643_v2 = vadd.f32 0.00028619796, %v642_v51  ;;  %v570_v13 = vmul.f32 %v569_v61, %v2929_v53 }
  0xcc   : > { %v544_v45 = vmul.f32 %v2489_v35, %v542_v19  ;;  %v2972_v49 = vadd.f32 1.0, %v581_v40  ;;  %v618_v50 = vadd.f32 0.112945676, %v617_v42  ;;  %vm549_vm1 = vweird.f32 %v2489_v35 }
  0xcd   : > { %v680_v58 = vmul.f32 %v2968_v43, %v2968_v43  ;;  %vm550_vm3 = vmor %vm548_vm2, %vm549_vm1  ;;  %v608_v14 = vmul.f32 %v607_v63, %v2943_v6  ;;  %v654_v16 = vadd.f32 0.001143296, %v653_v1  ;;  %v644_v17 = vmul.f32 %v643_v2, %v2963_v34 }
  0xce   : > { %v545_v52 = vsub.f32 1.0, %v544_v45  ;;  %2490 = vrcp.f32 %v2972_v49  ;;  %v619_v0 = vmul.f32 %v618_v50, %v2943_v6  ;;  %v488_v23 = vmul.f32 0.5, %v2914_v38 }
  0xcf   : > { %v2984_v7 = vmin.f32 %v680_v58, 16.0  ;;  %v655_v22 = vmul.f32 %v654_v16, %v2963_v34  ;;  %v571_v26 = vadd.f32 1.1283791, %v570_v13  ;;  %v609_v27 = vadd.f32 0.18741608, %v608_v14 }
  0xd0   : > { %v460_v41 = vpop.f32.mrf.mxu0  ;;  %v546_v60 = vmul.f32 %v2489_v35, %v545_v52  ;;  %v620_v10 = vadd.f32 0.4994258, %v619_v0  ;;  %v645_v31 = vadd.f32 0.0036580483, %v644_v17  ;;  %v594_v33 = vand.u32 2147483648, %v2972_v49 }
  0xd1   : > { %v2979_v59 = vadd.f32 %v2911_v36, %v460_v41  ;;  %v682_v24 = vmul.f32 2.1237322e-06, %v2984_v7  ;;  %v592_v38 = vand.u32 2147483647, %v2972_v49  ;;  %vm588_vm6 = vweird.f32 %v2972_v49 }
  0xd2   : > { %v547_v3 = vadd.f32 %v2489_v35, %v546_v60  ;;  %v621_v21 = vmul.f32 %v620_v10, %v2943_v6  ;;  %v572_v50 = vmul.f32 %v571_v26, %v2925_v47  ;;  %v595_v51 = vor.u32 1.1754944e-38, %v594_v33 }
  0xd3   : > { %v2987_v8 = vmul.f32 0.70710677, %v2979_v59  ;;  %v683_v40 = vadd.f32 0.00028619796, %v682_v24  ;;  %v610_v54 = vmul.f32 %v609_v27, %v2943_v6  ;;  %v646_v41 = vmul.f32 %v645_v31, %v2963_v34 }
  0xd4   : > { %v551_v9 = vsel %vm550_vm3, %v2489_v35, %v547_v3  ;;  %v2491_v12 = vpop.eup %2490  ;;  %v2999_v29 = vadd.f32 1.0, %v621_v21  ;;  %v656_v35 = vadd.f32 0.014752088, %v655_v22  ;;  %vm593_vm8 = vcmp.eq.f32.partialorder %v592_v38, 8.507059e+37 }
  0xd5   : > { %v556_v15 = vsel %vm553_vm4, %v555_v5, %v551_v9  ;;  %v584_v19 = vmul.f32 %v2491_v12, %v2972_v49  ;;  %v720_v53 = vmul.f32 %v2987_v8, %v2987_v8  ;;  %vm589_vm5 = vweird.f32 %v2491_v12 }
  0xd6   : > { %v557_v39 = vmul.f32 %v556_v15, %v532_v4  ;;  %2492 = vrcp.f32 %v2999_v29  ;;  %vm590_vm7 = vmor %vm588_vm6, %vm589_vm5  ;;  %v657_v52 = vmul.f32 %v656_v35, %v2963_v34  ;;  %v684_v58 = vmul.f32 %v683_v40, %v2984_v7 }
  0xd7   : > { %v585_v28 = vsub.f32 1.0, %v584_v19  ;;  %v3004_v42 = vmin.f32 %v720_v53, 16.0  ;;  %v693_v1 = vmul.f32 3.8918573e-05, %v2984_v7  ;;  %v489_v2 = vmul.f32 0.5, %v2922_v44 }
  0xd8   : > { %v463_v20 = vpop.f32.mrf.mxu0  ;;  %v2345_v25 = vclamps-f32 %v557_v39, 1.0  ;;  %v658_v0 = vadd.f32 0.112945676, %v657_v52  ;;  %v611_v3 = vadd.f32 1.1283791, %v610_v54  ;;  %v634_v16 = vand.u32 2147483648, %v2999_v29 }
  0xd9   : > { %v586_v37 = vmul.f32 %v2491_v12, %v585_v28  ;;  %v3009_v46 = vadd.f32 %v2911_v36, %v463_v20  ;;  %v722_v60 = vmul.f32 2.1237322e-06, %v3004_v42  ;;  %v647_v4 = vadd.f32 0.05243302, %v646_v41 }
  0xda   : > { %v1160_v32 = vadd.f32 1.0, %v2345_v25  ;;  %v685_v9 = vadd.f32 0.0036580483, %v684_v58  ;;  %v659_v13 = vmul.f32 %v658_v0, %v2963_v34  ;;  %v694_v17 = vadd.f32 0.001143296, %v693_v1 }
  0xdb   : > { %v587_v48 = vadd.f32 %v2491_v12, %v586_v37  ;;  %v3020_v47 = vmul.f32 0.70710677, %v3009_v46  ;;  %v723_v10 = vadd.f32 0.00028619796, %v722_v60  ;;  %v632_v19 = vand.u32 2147483647, %v2999_v29 }
  0xdc   : > { %v3006_v45 = vmul.f32 %v1160_v32, %v488_v23  ;;  %v2493_v61 = vpop.eup %2492  ;;  %v660_v44 = vadd.f32 0.4994258, %v659_v13  ;;  %v612_v20 = vmul.f32 %v611_v3, %v2937_v62  ;;  %v695_v23 = vmul.f32 %v694_v17, %v2984_v7 }
  0xdd   : > { %v591_v56 = vsel %vm590_vm7, %v2491_v12, %v587_v48  ;;  %v624_v6 = vmul.f32 %v2493_v61, %v2999_v29  ;;  %v760_v14 = vmul.f32 %v3020_v47, %v3020_v47  ;;  %vm629_vm9 = vweird.f32 %v2493_v61 }
  0xde   : > { %1192 = vadd.xlane.f32.xlu0 %v3006_v45  ;;  %v596_v49 = vsel %vm593_vm8, %v595_v51, %v591_v56  ;;  %v648_v24 = vmul.f32 %v647_v4, %v2963_v34  ;;  %vm628_vm10 = vweird.f32 %v2999_v29  ;;  %v661_v25 = vmul.f32 %v660_v44, %v2963_v34 }
  0xdf   : > { %v597_v63 = vmul.f32 %v596_v49, %v572_v50  ;;  %v625_v12 = vsub.f32 1.0, %v624_v6  ;;  %v686_v26 = vmul.f32 %v685_v9, %v2984_v7  ;;  %vm630_vm11 = vmor %vm628_vm10, %vm629_vm9  ;;  %v635_v27 = vor.u32 1.1754944e-38, %v634_v16 }
  0xe0   : > { %v465_v55 = vpop.f32.mrf.mxu0  ;;  %v696_v28 = vadd.f32 0.014752088, %v695_v23  ;;  %v733_v62 = vmul.f32 3.8918573e-05, %v3004_v42  ;;  %v724_v31 = vmul.f32 %v723_v10, %v3004_v42  ;;  %v3041_v32 = vmin.f32 %v760_v14, 16.0 }
  0xe1   : > { %v2346_v5 = vclamps-f32 %v597_v63, 1.0  ;;  %v626_v39 = vmul.f32 %v2493_v61, %v625_v12  ;;  %vm633_vm12 = vcmp.eq.f32.partialorder %v632_v19, 8.507059e+37  ;;  %v3044_v35 = vadd.f32 %v2911_v36, %v465_v55 }
  0xe2   : > { %v662_v38 = vadd.f32 1.0, %v661_v25  ;;  %v697_v48 = vmul.f32 %v696_v28, %v2984_v7  ;;  %v649_v50 = vadd.f32 0.18741608, %v648_v24  ;;  %v762_v51 = vmul.f32 2.1237322e-06, %v3041_v32 }
  0xe3   : > { %v1161_v15 = vadd.f32 1.0, %v2346_v5  ;;  %v627_v53 = vadd.f32 %v2493_v61, %v626_v39  ;;  %v734_v52 = vadd.f32 0.001143296, %v733_v62  ;;  %v687_v54 = vadd.f32 0.05243302, %v686_v26 }
  0xe4   : > { %2494 = vrcp.f32 %v662_v38  ;;  %v725_v41 = vadd.f32 0.0036580483, %v724_v31  ;;  %v3052_v58 = vmul.f32 0.70710677, %v3044_v35  ;;  %v698_v49 = vadd.f32 0.112945676, %v697_v48 }
  0xe5   : > { %v3031_v21 = vmul.f32 %v1161_v15, %v489_v2  ;;  %v631_v33 = vsel %vm630_vm11, %v2493_v61, %v627_v53  ;;  %v490_v61 = vmul.f32 0.5, %v2933_v57  ;;  %v650_v0 = vmul.f32 %v649_v50, %v2963_v34 }
  0xe6   : > { %v636_v37 = vsel %vm633_vm12, %v635_v27, %v631_v33  ;;  %v763_v1 = vadd.f32 0.00028619796, %v762_v51  ;;  %v699_v6 = vmul.f32 %v698_v49, %v2984_v7  ;;  %v735_v2 = vmul.f32 %v734_v52, %v3004_v42 }
  0xe7   : > { %1194 = vadd.xlane.f32.xlu0 %v3031_v21  ;;  %v637_v40 = vmul.f32 %v636_v37, %v612_v20  ;;  %v688_v3 = vmul.f32 %v687_v54, %v2984_v7  ;;  %v726_v4 = vmul.f32 %v725_v41, %v3004_v42  ;;  %v800_v10 = vmul.f32 %v3052_v58, %v3052_v58 }
  0xe8   : > { %v468_v22 = vpop.f32.mrf.mxu0  ;;  %v700_v12 = vadd.f32 0.4994258, %v699_v6  ;;  %v651_v13 = vadd.f32 1.1283791, %v650_v0  ;;  %v764_v14 = vmul.f32 %v763_v1, %v3041_v32  ;;  %v736_v16 = vadd.f32 0.014752088, %v735_v2 }
  0xe9   : > { %v3047_v29 = vadd.f32 %v2911_v36, %v468_v22  ;;  %v2347_v56 = vclamps-f32 %v637_v40, 1.0  ;;  %v689_v17 = vadd.f32 0.18741608, %v688_v3  ;;  %v727_v39 = vadd.f32 0.05243302, %v726_v4 }
  0xea   : > { %v2495_v9 = vpop.eup %2494  ;;  %v701_v15 = vmul.f32 %v700_v12, %v2984_v7  ;;  %v3072_v44 = vmin.f32 %v800_v10, 16.0  ;;  %v674_v22 = vand.u32 2147483648, %v662_v38  ;;  %v672_v25 = vand.u32 2147483647, %v662_v38 }
  0xeb   : > { %v3055_v55 = vmul.f32 0.70710677, %v3047_v29  ;;  %v1162_v63 = vadd.f32 1.0, %v2347_v56  ;;  %v664_v34 = vmul.f32 %v2495_v9, %v662_v38  ;;  %vm669_vm13 = vweird.f32 %v2495_v9 }
  0xec   : > { %v3076_v24 = vadd.f32 1.0, %v701_v15  ;;  %v737_v26 = vmul.f32 %v736_v16, %v3004_v42  ;;  %v765_v27 = vadd.f32 0.0036580483, %v764_v14  ;;  %v802_v28 = vmul.f32 2.1237322e-06, %v3072_v44 }
  0xed   : > { %v3063_v5 = vmul.f32 %v1162_v63, %v490_v61  ;;  %v840_v57 = vmul.f32 %v3055_v55, %v3055_v55  ;;  %v665_v19 = vsub.f32 1.0, %v664_v34  ;;  %vm668_vm14 = vweird.f32 %v662_v38 }
  0xee   : > { %2496 = vrcp.f32 %v3076_v24  ;;  %v652_v33 = vmul.f32 %v651_v13, %v2952_v18  ;;  %v690_v37 = vmul.f32 %v689_v17, %v2984_v7  ;;  %vm670_vm15 = vmor %vm668_vm14, %vm669_vm13  ;;  %v675_v40 = vor.u32 1.1754944e-38, %v674_v22 }
  0xef   : > { %1196 = vadd.xlane.f32.xlu1 %v3063_v5  ;;  %v3074_v20 = vmin.f32 %v840_v57, 16.0  ;;  %v666_v53 = vmul.f32 %v2495_v9, %v665_v19  ;;  %v728_v50 = vmul.f32 %v727_v39, %v3004_v42  ;;  %vm673_vm0 = vcmp.eq.f32.partialorder %v672_v25, 8.507059e+37 }
  0xf0   : > { %v470_v60 = vpop.f32.mrf.mxu0  ;;  %v738_v52 = vadd.f32 0.112945676, %v737_v26  ;;  %v766_v54 = vmul.f32 %v765_v27, %v3041_v32  ;;  %v803_v41 = vadd.f32 0.00028619796, %v802_v28  ;;  %v491_v63 = vmul.f32 0.5, %v2946_v11 }
  0xf1   : > { %v842_v62 = vmul.f32 2.1237322e-06, %v3074_v20  ;;  %v667_v31 = vadd.f32 %v2495_v9, %v666_v53  ;;  %v3090_v38 = vadd.f32 %v2911_v36, %v470_v60  ;;  %v691_v0 = vadd.f32 1.1283791, %v690_v37 }
  0xf2   : > { %v739_v7 = vmul.f32 %v738_v52, %v3004_v42  ;;  %v729_v2 = vadd.f32 0.18741608, %v728_v50  ;;  %v767_v60 = vadd.f32 0.05243302, %v766_v54  ;;  %v804_v10 = vmul.f32 %v803_v41, %v3072_v44 }
  0xf3   : > { %v671_v51 = vsel %vm670_vm15, %v2495_v9, %v667_v31  ;;  %v843_v49 = vadd.f32 0.00028619796, %v842_v62  ;;  %v773_v9 = vmul.f32 3.8918573e-05, %v3041_v32  ;;  %v853_v12 = vmul.f32 3.8918573e-05, %v3074_v20 }
  0xf4   : > { %v676_v56 = vsel %vm673_vm0, %v675_v40, %v671_v51  ;;  %v2497_v61 = vpop.eup %2496  ;;  %v740_v57 = vadd.f32 0.4994258, %v739_v7  ;;  %v3105_v34 = vmul.f32 0.70710677, %v3090_v38  ;;  %v712_v16 = vand.u32 2147483647, %v3076_v24 }
  0xf5   : > { %v677_v18 = vmul.f32 %v676_v56, %v652_v33  ;;  %v704_v4 = vmul.f32 %v2497_v61, %v3076_v24  ;;  %v844_v11 = vmul.f32 %v843_v49, %v3074_v20  ;;  %v714_v17 = vand.u32 2147483648, %v3076_v24 }
  0xf6   : > { %v741_v39 = vmul.f32 %v740_v57, %v3004_v42  ;;  %vm709_vm1 = vweird.f32 %v2497_v61  ;;  %v692_v53 = vmul.f32 %v691_v0, %v2968_v43  ;;  %v730_v25 = vmul.f32 %v729_v2, %v3004_v42 }
  0xf7   : > { %v2348_v3 = vclamps-f32 %v677_v18, 1.0  ;;  %v705_v14 = vsub.f32 1.0, %v704_v4  ;;  %v854_v27 = vadd.f32 0.001143296, %v853_v12  ;;  %v768_v28 = vmul.f32 %v767_v60, %v3041_v32 }
  0xf8   : > { %v473_v23 = vpop.f32.mrf.mxu0  ;;  %v3116_v26 = vadd.f32 1.0, %v741_v39  ;;  %v805_v62 = vadd.f32 0.0036580483, %v804_v10  ;;  %vm708_vm2 = vweird.f32 %v3076_v24  ;;  %v880_v33 = vmul.f32 %v3105_v34, %v3105_v34 }
  0xf9   : > { %v3085_v48 = vadd.f32 %v2911_v36, %v473_v23  ;;  %v1163_v13 = vadd.f32 1.0, %v2348_v3  ;;  %v706_v22 = vmul.f32 %v2497_v61, %v705_v14  ;;  %v774_v23 = vadd.f32 0.001143296, %v773_v9  ;;  %vm710_vm3 = vmor %vm708_vm2, %vm709_vm1 }
  0xfa   : > { %v715_v43 = vor.u32 1.1754944e-38, %v714_v17  ;;  %2498 = vrcp.f32 %v3116_v26  ;;  %v845_v42 = vadd.f32 0.0036580483, %v844_v11  ;;  %vm713_vm4 = vcmp.eq.f32.partialorder %v712_v16, 8.507059e+37 }
  0xfb   : > { %v3095_v1 = vmul.f32 0.70710677, %v3085_v48  ;;  %v3112_v19 = vmul.f32 %v1163_v13, %v491_v63  ;;  %v707_v31 = vadd.f32 %v2497_v61, %v706_v22  ;;  %v775_v51 = vmul.f32 %v774_v23, %v3041_v32 }
  0xfc   : > { %v731_v52 = vadd.f32 1.1283791, %v730_v25  ;;  %v855_v24 = vmul.f32 %v854_v27, %v3074_v20  ;;  %v769_v56 = vadd.f32 0.18741608, %v768_v28  ;;  %v806_v49 = vmul.f32 %v805_v62, %v3072_v44 }
  0xfd   : > { %v920_v15 = vmul.f32 %v3095_v1, %v3095_v1  ;;  %1198 = vadd.xlane.f32.xlu1 %v3112_v19  ;;  %v711_v40 = vsel %vm710_vm3, %v2497_v61, %v707_v31  ;;  %v492_v7 = vmul.f32 0.5, %v2961_v30  ;;  %v846_v61 = vmul.f32 %v845_v42, %v3074_v20 }
  0xfe   : > { %v716_v41 = vsel %vm713_vm4, %v715_v43, %v711_v40  ;;  %v3135_v0 = vmin.f32 %v880_v33, 16.0  ;;  %v776_v3 = vadd.f32 0.014752088, %v775_v51  ;;  %v732_v9 = vmul.f32 %v731_v52, %v2987_v8 }
  0xff   : > { %v3123_v37 = vmin.f32 %v920_v15, 16.0  ;;  %v717_v18 = vmul.f32 %v716_v41, %v692_v53  ;;  %v856_v10 = vadd.f32 0.014752088, %v855_v24  ;;  %v770_v12 = vmul.f32 %v769_v56, %v3041_v32 }
 0x100   : > { %v3097_v6 = vpop.f32.mrf.mxu0  ;;  %v2499_v4 = vpop.eup %2498  ;;  %v807_v11 = vadd.f32 0.05243302, %v806_v49  ;;  %v882_v14 = vmul.f32 2.1237322e-06, %v3135_v0  ;;  %v777_v16 = vmul.f32 %v776_v3, %v3041_v32  ;;  %v847_v8 = vadd.f32 0.05243302, %v846_v61 }
 0x101   : > { %v922_v54 = vmul.f32 2.1237322e-06, %v3123_v37  ;;  %v2349_v2 = vclamps-f32 %v717_v18, 1.0  ;;  %v933_v57 = vmul.f32 3.8918573e-05, %v3123_v37  ;;  %v744_v13 = vmul.f32 %v2499_v4, %v3116_v26 }
 0x102   : > { %v857_v17 = vmul.f32 %v856_v10, %v3074_v20  ;;  %v754_v25 = vand.u32 2147483648, %v3116_v26  ;;  %v778_v27 = vadd.f32 0.112945676, %v777_v16  ;;  %v808_v62 = vmul.f32 %v807_v11, %v3072_v44 }
 0x103   : > { %v923_v60 = vadd.f32 0.00028619796, %v922_v54  ;;  %v1164_v30 = vadd.f32 1.0, %v2349_v2  ;;  %v745_v22 = vsub.f32 1.0, %v744_v13  ;;  %v934_v23 = vadd.f32 0.001143296, %v933_v57 }
 0x104   : > { %v858_v28 = vadd.f32 0.112945676, %v857_v17  ;;  %vm749_vm5 = vweird.f32 %v2499_v4  ;;  %v752_v33 = vand.u32 2147483647, %v3116_v26  ;;  %v779_v42 = vmul.f32 %v778_v27, %v3041_v32 }
 0x105   : > { %v3147_v39 = vmul.f32 %v1164_v30, %v492_v7  ;;  %v924_v53 = vmul.f32 %v923_v60, %v3123_v37  ;;  %v746_v31 = vmul.f32 %v2499_v4, %v745_v22  ;;  %v848_v51 = vmul.f32 %v847_v8, %v3074_v20 }
 0x106   : > { %v859_v40 = vmul.f32 %v858_v28, %v3074_v20  ;;  %v883_v52 = vadd.f32 0.00028619796, %v882_v14  ;;  %vm748_vm6 = vweird.f32 %v3116_v26  ;;  %v755_v56 = vor.u32 1.1754944e-38, %v754_v25 }
 0x107   : > { %1200 = vadd.xlane.f32.xlu2 %v3147_v39  ;;  %v747_v54 = vadd.f32 %v2499_v4, %v746_v31  ;;  %v925_v24 = vadd.f32 0.0036580483, %v924_v53  ;;  %vm750_vm7 = vmor %vm748_vm6, %vm749_vm5  ;;  %v780_v49 = vadd.f32 0.4994258, %v779_v42  ;;  %v809_v7 = vadd.f32 0.18741608, %v808_v62 }
 0x108   : > { %v478_v50 = vpop.f32.mrf.mxu0  ;;  %vm753_vm8 = vcmp.eq.f32.partialorder %v752_v33, 8.507059e+37  ;;  %v860_v2 = vadd.f32 0.4994258, %v859_v40  ;;  %v884_v26 = vmul.f32 %v883_v52, %v3135_v0  ;;  %v849_v14 = vadd.f32 0.18741608, %v848_v51 }
 0x109   : > { %v3132_v63 = vadd.f32 %v2911_v36, %v478_v50  ;;  %v935_v50 = vmul.f32 %v934_v23, %v3123_v37  ;;  %v751_v61 = vsel %vm750_vm7, %v2499_v4, %v747_v54  ;;  %v781_v10 = vmul.f32 %v780_v49, %v3041_v32 }
 0x10a   : > { %v756_v3 = vsel %vm753_vm8, %v755_v56, %v751_v61  ;;  %v861_v13 = vmul.f32 %v860_v2, %v3074_v20  ;;  %v926_v16 = vmul.f32 %v925_v24, %v3123_v37  ;;  %v493_v23 = vmul.f32 0.5, %v2979_v59 }
 0x10b   : > { %v3143_v15 = vmul.f32 0.70710677, %v3132_v63  ;;  %v936_v57 = vadd.f32 0.014752088, %v935_v50  ;;  %v757_v11 = vmul.f32 %v756_v3, %v732_v9  ;;  %v3174_v17 = vadd.f32 1.0, %v781_v10 }
 0x10c   : > { %v3178_v22 = vadd.f32 1.0, %v861_v13  ;;  %v813_v9 = vmul.f32 3.8918573e-05, %v3072_v44  ;;  %v771_v53 = vadd.f32 1.1283791, %v770_v12  ;;  %v810_v27 = vmul.f32 %v809_v7, %v3072_v44 }
 0x10d   : > { %v1000_v43 = vmul.f32 %v3143_v15, %v3143_v15  ;;  %v2350_v8 = vclamps-f32 %v757_v11, 1.0  ;;  %2500 = vrcp.f32 %v3174_v17  ;;  %v937_v25 = vmul.f32 %v936_v57, %v3123_v37 }
 0x10e   : > { %v885_v28 = vadd.f32 0.0036580483, %v884_v26  ;;  %v927_v42 = vadd.f32 0.05243302, %v926_v16  ;;  %2502 = vrcp.f32 %v3178_v22  ;;  %v3190_v59 = vmul.f32 0.5, %v3009_v46 }
 0x10f   : > { %v3164_v60 = vmin.f32 %v1000_v43, 16.0  ;;  %v1165_v62 = vadd.f32 1.0, %v2350_v8  ;;  %v850_v43 = vmul.f32 %v849_v14, %v3074_v20  ;;  %v814_v51 = vadd.f32 0.001143296, %v813_v9 }
 0x110   : > { %v480_v41 = vpop.f32.mrf.mxu0  ;;  %v772_v52 = vmul.f32 %v771_v53, %v3020_v47  ;;  %v3197_v54 = vmul.f32 0.5, %v3047_v29  ;;  %v938_v20 = vadd.f32 0.112945676, %v937_v25  ;;  %v3200_v24 = vadd.f32 1.1283791, %v810_v27 }
 0x111   : > { %v3162_v18 = vadd.f32 %v2911_v36, %v480_v41  ;;  %v1002_v4 = vmul.f32 2.1237322e-06, %v3164_v60  ;;  %v3192_v12 = vmul.f32 %v1165_v62, %v493_v23  ;;  %v886_v56 = vmul.f32 %v885_v28, %v3135_v0 }
 0x112   : > { %v3205_v46 = vadd.f32 %v2911_v36, %v3097_v6  ;;  %v3208_v61 = vadd.f32 1.1283791, %v850_v43  ;;  %v928_v47 = vmul.f32 %v927_v42, %v3123_v37  ;;  %vm788_vm9 = vweird.f32 %v3174_v17 }
 0x113   : > { %v3169_v30 = vmul.f32 0.70710677, %v3162_v18  ;;  %v1003_v40 = vadd.f32 0.00028619796, %v1002_v4  ;;  %1202 = vadd.xlane.f32.xlu2 %v3192_v12  ;;  %v2501_v7 = vpop.eup %2500  ;;  %v815_v6 = vmul.f32 %v814_v51, %v3072_v44  ;;  %v792_v26 = vand.u32 2147483647, %v3174_v17 }
 0x114   : > { %v784_v3 = vmul.f32 %v2501_v7, %v3174_v17  ;;  %v3216_v57 = vpop.eup %2502  ;;  %v794_v11 = vand.u32 2147483648, %v3174_v17  ;;  %v939_v14 = vmul.f32 %v938_v20, %v3123_v37  ;;  %vm789_vm10 = vweird.f32 %v2501_v7 }
 0x115   : > { %v1040_v32 = vmul.f32 %v3169_v30, %v3169_v30  ;;  %v1004_v29 = vmul.f32 %v1003_v40, %v3164_v60  ;;  %v887_v9 = vadd.f32 0.05243302, %v886_v56  ;;  %v3228_v27 = vmul.f32 0.70710677, %v3205_v46  ;;  %vm3233_vm11 = vmor %vm788_vm9, %vm789_vm10 }
 0x116   : > { %v785_v16 = vsub.f32 1.0, %v784_v3  ;;  %v929_v42 = vadd.f32 0.18741608, %v928_v47  ;;  %vm793_vm12 = vcmp.eq.f32.partialorder %v792_v26, 8.507059e+37  ;;  %v940_v56 = vadd.f32 0.4994258, %v939_v14 }
 0x117   : > { %v3185_v31 = vmin.f32 %v1040_v32, 16.0  ;;  %v864_v32 = vmul.f32 %v3216_v57, %v3178_v22  ;;  %v1005_v23 = vadd.f32 0.0036580483, %v1004_v29  ;;  %vm868_vm13 = vweird.f32 %v3178_v22 }
 0x118   : > { %v483_v33 = vpop.f32.mrf.mxu0  ;;  %v786_v28 = vmul.f32 %v2501_v7, %v785_v16  ;;  %vm869_vm14 = vweird.f32 %v3216_v57 }
 0x119   : > { %v1042_v50 = vmul.f32 2.1237322e-06, %v3185_v31  ;;  %v1053_v41 = vmul.f32 3.8918573e-05, %v3185_v31  ;;  %v865_v43 = vsub.f32 1.0, %v864_v32  ;;  %v1006_v29 = vmul.f32 %v1005_v23, %v3164_v60  ;;  %vm3269_vm15 = vmor %vm868_vm13, %vm869_vm14 }
 0x11a   : > { %v787_v20 = vadd.f32 %v2501_v7, %v786_v28  ;;  %v3243_v47 = vadd.f32 %v2911_v36, %v483_v33  ;;  %v872_v33 = vand.u32 2147483647, %v3178_v22  ;;  %v874_v32 = vand.u32 2147483648, %v3178_v22 }
 0x11b   : > { %v1043_v49 = vadd.f32 0.00028619796, %v1042_v50  ;;  %v1054_v2 = vadd.f32 0.001143296, %v1053_v41  ;;  %v795_v50 = vor.u32 1.1754944e-38, %v794_v11  ;;  %v866_v11 = vmul.f32 %v3216_v57, %v865_v43 }
 0x11c   : > { %v791_v3 = vsel %vm3233_vm11, %v2501_v7, %v787_v20  ;;  %v960_v7 = vmul.f32 %v3228_v27, %v3228_v27  ;;  %v1007_v20 = vadd.f32 0.05243302, %v1006_v29  ;;  %v875_v22 = vor.u32 1.1754944e-38, %v874_v32 }
 0x11d   : > { %v1044_v10 = vmul.f32 %v1043_v49, %v3185_v31  ;;  %v1055_v13 = vmul.f32 %v1054_v2, %v3185_v31  ;;  %v816_v49 = vadd.f32 0.014752088, %v815_v6  ;;  %v796_v26 = vsel %vm793_vm12, %v795_v50, %v791_v3 }
 0x11e   : > { %v867_v28 = vadd.f32 %v3216_v57, %v866_v11  ;;  %vm873_vm0 = vcmp.eq.f32.partialorder %v872_v33, 8.507059e+37  ;;  %v1008_v32 = vmul.f32 %v1007_v20, %v3164_v60  ;;  %v3320_v43 = vmul.f32 0.5, %v3162_v18 }
 0x11f   : > { %v1045_v4 = vadd.f32 0.0036580483, %v1044_v10  ;;  %v1056_v25 = vadd.f32 0.014752088, %v1055_v13  ;;  %v941_v13 = vmul.f32 %v940_v56, %v3123_v37  ;;  %v817_v50 = vmul.f32 %v816_v49, %v3072_v44 }
 0x120   : > { %v485_v8 = vpop.f32.mrf.mxu0  ;;  %v871_v49 = vsel %vm3269_vm15, %v3216_v57, %v867_v28  ;;  %v3323_v20 = vadd.f32 0.18741608, %v1008_v32 }
 0x121   : > { %v3225_v53 = vadd.f32 %v2911_v36, %v485_v8  ;;  %v1046_v62 = vmul.f32 %v1045_v4, %v3185_v31  ;;  %v1057_v41 = vmul.f32 %v1056_v25, %v3185_v31  ;;  %v797_v36 = vmul.f32 %v796_v26, %v772_v52 }
 0x122   : > { %v3257_v16 = vadd.f32 1.0, %v941_v13  ;;  %v818_v29 = vadd.f32 0.112945676, %v817_v50  ;;  %v876_v33 = vsel %vm873_vm0, %v875_v22, %v871_v49 }
 0x123   : > { %v3238_v51 = vmul.f32 0.70710677, %v3225_v53  ;;  %v1058_v2 = vadd.f32 0.112945676, %v1057_v41  ;;  %v1047_v10 = vadd.f32 0.05243302, %v1046_v62  ;;  %v930_v41 = vmul.f32 %v929_v42, %v3123_v37 }
 0x124   : > { %v2351_v23 = vclamps-f32 %v797_v36, 1.0  ;;  %2504 = vrcp.f32 %v3257_v16  ;;  %v888_v37 = vmul.f32 %v887_v9, %v3135_v0  ;;  %v2746_v9 = vmov 128.0  }
 0x125   : > { %v1120_v17 = vmul.f32 %v3238_v51, %v3238_v51  ;;  %v1059_v6 = vmul.f32 %v1058_v2, %v3185_v31  ;;  %v1048_v25 = vmul.f32 %v1047_v10, %v3185_v31  ;;  %v931_v36 = vadd.f32 1.1283791, %v930_v41 }
 0x126   : > { %v1166_v56 = vadd.f32 1.0, %v2351_v23  ;;  %vm948_vm3 = vweird.f32 %v3257_v16 }
 0x127   : > { %v3251_v14 = vmin.f32 %v1120_v17, 16.0  ;;  %v1060_v8 = vadd.f32 0.4994258, %v1059_v6  ;;  %v3277_v17 = vmul.f32 0.70710677, %v3243_v47  ;;  %v3294_v6 = vmul.f32 %v3200_v24, %v3052_v58 }
 0x128   : > { %v3283_v11 = vmul.f32 %v1166_v56, %v3190_v59  ;;  %v1049_v13 = vadd.f32 0.18741608, %v1048_v25  ;;  %v852_v59 = vmul.f32 %v3208_v61, %v3055_v55  ;;  %v3307_v55 = vadd.f32 0.18741608, %v888_v37 }
 0x129   : > { %v1122_v4 = vmul.f32 2.1237322e-06, %v3251_v14  ;;  %v1061_v62 = vmul.f32 %v1060_v8, %v3185_v31  ;;  %v1133_v40 = vmul.f32 3.8918573e-05, %v3251_v14  ;;  %v3301_v8 = vmin.f32 %v960_v7, 16.0 }
 0x12a   : > { %v3290_v26 = vpop.eup %2504  ;;  %1204 = vadd.xlane.f32.xlu2 %v3283_v11  ;;  %v1050_v58 = vmul.f32 %v1049_v13, %v3185_v31  ;;  %v1080_v24 = vmul.f32 %v3277_v17, %v3277_v17  ;;  %v819_v25 = vmul.f32 %v818_v29, %v3072_v44  ;;  %v3313_v28 = vmul.f32 %v931_v36, %v3095_v1 }
 0x12b   : > { %v1123_v52 = vadd.f32 0.00028619796, %v1122_v4  ;;  %v3280_v3 = vadd.f32 1.0, %v1061_v62  ;;  %v1134_v10 = vadd.f32 0.001143296, %v1133_v40  ;;  %v944_v23 = vmul.f32 %v3290_v26, %v3257_v16 }
 0x12c   : > { %v3316_v7 = vmul.f32 2.1237322e-06, %v3301_v8  ;;  %v1013_v31 = vmul.f32 3.8918573e-05, %v3164_v60  ;;  %v820_v41 = vadd.f32 0.4994258, %v819_v25  ;;  %vm949_vm5 = vweird.f32 %v3290_v26 }
 0x12d   : > { %v1124_v2 = vmul.f32 %v1123_v52, %v3251_v14  ;;  %2506 = vrcp.f32 %v3280_v3  ;;  %v1135_v4 = vmul.f32 %v1134_v10, %v3251_v14  ;;  %v877_v52 = vmul.f32 %v876_v33, %v852_v59  ;;  %vm3360_vm7 = vmor %vm948_vm3, %vm949_vm5 }
 0x12e   : > { %2508 = vrcp.f32 %v2746_v9  ;;  %v1051_v56 = vadd.f32 1.1283791, %v1050_v58  ;;  %v945_v13 = vsub.f32 1.0, %v944_v23  ;;  %v821_v49 = vmul.f32 %v820_v41, %v3072_v44 }
 0x12f   : > { %v1125_v42 = vadd.f32 0.0036580483, %v1124_v2  ;;  %v1136_v61 = vadd.f32 0.014752088, %v1135_v4  ;;  %v3325_v2 = vmin.f32 %v1080_v24, 16.0  ;;  %v2353_v29 = vclamps-f32 %v877_v52, 1.0 }
 0x130   : > { %v1014_v37 = vadd.f32 0.001143296, %v1013_v31  ;;  %vm1068_vm1 = vweird.f32 %v3280_v3  ;;  %v3336_v33 = vadd.f32 1.0, %v821_v49  ;;  %v1072_v4 = vand.u32 2147483647, %v3280_v3 }
 0x131   : > { %v1126_v57 = vmul.f32 %v1125_v42, %v3251_v14  ;;  %v1137_v50 = vmul.f32 %v1136_v61, %v3251_v14  ;;  %v1074_v42 = vand.u32 2147483648, %v3280_v3  ;;  %v946_v58 = vmul.f32 %v3290_v26, %v945_v13 }
 0x132   : > { %v1015_v44 = vmul.f32 %v1014_v37, %v3164_v60  ;;  %2510 = vrcp.f32 %v3336_v33  ;;  %v1052_v24 = vmul.f32 %v1051_v56, %v3169_v30  ;;  %vm1073_vm6 = vcmp.eq.f32.partialorder %v1072_v4, 8.507059e+37 }
 0x133   : > { %v2507_v62 = vpop.eup %2506  ;;  %v1127_v40 = vadd.f32 0.05243302, %v1126_v57  ;;  %v1138_v10 = vadd.f32 0.112945676, %v1137_v50  ;;  %v1075_v23 = vor.u32 1.1754944e-38, %v1074_v42  ;;  %v3353_v56 = vadd.f32 %v3290_v26, %v946_v58 }
 0x134   : > { %v1064_v1 = vmul.f32 %v2507_v62, %v3280_v3  ;;  %v3328_v22 = vpop.eup %2508  ;;  %vm1069_vm2 = vweird.f32 %v2507_v62  ;;  %v952_v41 = vand.u32 2147483647, %v3257_v16  ;;  %v893_v3 = vmul.f32 3.8918573e-05, %v3135_v0 }
 0x135   : > { %v1225_v59 = vmul.f32 128.0, %v3328_v22  ;;  %v1128_v36 = vmul.f32 %v1127_v40, %v3251_v14  ;;  %v1139_v57 = vmul.f32 %v1138_v10, %v3251_v14  ;;  %vm1070_vm4 = vmor %vm1068_vm1, %vm1069_vm2  ;;  %v954_v40 = vand.u32 2147483648, %v3257_v16 }
 0x136   : > { %v1065_v18 = vsub.f32 1.0, %v1064_v1  ;;  %v1016_v1 = vadd.f32 0.014752088, %v1015_v44  ;;  %v1082_v13 = vmul.f32 2.1237322e-06, %v3325_v2  ;;  %vm1229_vm8 = vweird.f32 %v3328_v22 }
 0x137   : > { %v1140_v32 = vadd.f32 0.4994258, %v1139_v57  ;;  %v1226_v25 = vsub.f32 1.0, %v1225_v59  ;;  %v1129_v52 = vadd.f32 0.18741608, %v1128_v36  ;;  %v1168_v36 = vadd.f32 1.0, %v2353_v29 }
 0x138   : > { %v1066_v9 = vmul.f32 %v2507_v62, %v1065_v18  ;;  %v1017_v18 = vmul.f32 %v1016_v1, %v3164_v60  ;;  %v2511_v42 = vpop.eup %2510  ;;  %v955_v57 = vor.u32 1.1754944e-38, %v954_v40  ;;  %v832_v16 = vand.u32 2147483647, %v3336_v33 }
 0x139   : > { %v1141_v31 = vmul.f32 %v1140_v32, %v3251_v14  ;;  %v1227_v37 = vmul.f32 %v3328_v22, %v1226_v25  ;;  %v1130_v59 = vmul.f32 %v1129_v52, %v3251_v14  ;;  %v824_v4 = vmul.f32 %v2511_v42, %v3336_v33 }
 0x13a   : > { %v1067_v61 = vadd.f32 %v2507_v62, %v1066_v9  ;;  %v951_v44 = vsel %vm3360_vm7, %v3290_v26, %v3353_v56  ;;  %vm3374_vm9 = vcmp.eq.f32.partialorder %v952_v41, 8.507059e+37  ;;  %v834_v14 = vand.u32 2147483648, %v3336_v33 }
 0x13b   : > { %v3350_v30 = vadd.f32 1.0, %v1141_v31  ;;  %v1018_v29 = vadd.f32 0.112945676, %v1017_v18  ;;  %v894_v58 = vadd.f32 0.001143296, %v893_v3  ;;  %vm828_vm10 = vweird.f32 %v3336_v33 }
 0x13c   : > { %v1071_v50 = vsel %vm1070_vm4, %v2507_v62, %v1067_v61  ;;  %v1228_v61 = vadd.f32 %v3328_v22, %v1227_v37  ;;  %v973_v25 = vmul.f32 3.8918573e-05, %v3301_v8  ;;  %v1131_v52 = vadd.f32 1.1283791, %v1130_v59 }
 0x13d   : > { %v1076_v10 = vsel %vm1073_vm6, %v1075_v23, %v1071_v50  ;;  %2512 = vrcp.f32 %v3350_v30  ;;  %v825_v23 = vsub.f32 1.0, %v824_v4  ;;  %v1019_v31 = vmul.f32 %v1018_v29, %v3164_v60 }
 0x13e   : > { %v1077_v49 = vmul.f32 %v1076_v10, %v1052_v24  ;;  %v895_v26 = vmul.f32 %v894_v58, %v3135_v0  ;;  %vm829_vm11 = vweird.f32 %v2511_v42  ;;  %v974_v41 = vadd.f32 0.001143296, %v973_v25 }
 0x13f   : > { %v826_v50 = vmul.f32 %v2511_v42, %v825_v23  ;;  %vm3387_vm12 = vcmp.eq.f32.partialorder %v832_v16, 8.507059e+37  ;;  %v835_v56 = vor.u32 1.1754944e-38, %v834_v14  ;;  %v1020_v3 = vadd.f32 0.4994258, %v1019_v31  ;;  %vm830_vm14 = vmor %vm828_vm10, %vm829_vm11 }
 0x140   : > { %v2358_v9 = vclamps-f32 %v1077_v49, 1.0  ;;  %v896_v49 = vadd.f32 0.014752088, %v895_v26  ;;  %v3395_v37 = vsel %vm1229_vm8, %v3328_v22, %v1228_v61  ;;  %v975_v18 = vmul.f32 %v974_v41, %v3301_v8 }
 0x141   : > { %v827_v62 = vadd.f32 %v2511_v42, %v826_v50  ;;  %vm1148_vm13 = vweird.f32 %v3350_v30  ;;  %v1152_v59 = vand.u32 2147483647, %v3350_v30  ;;  %v1093_v22 = vmul.f32 3.8918573e-05, %v3325_v2 }
 0x142   : > { %v1173_v24 = vadd.f32 1.0, %v2358_v9  ;;  %v1021_v9 = vmul.f32 %v1020_v3, %v3164_v60  ;;  %v897_v4 = vmul.f32 %v896_v49, %v3135_v0  ;;  %v976_v29 = vadd.f32 0.014752088, %v975_v18 }
 0x143   : > { %v2513_v1 = vpop.eup %2512  ;;  %v831_v14 = vsel %vm830_vm14, %v2511_v42, %v827_v62  ;;  %v1154_v58 = vand.u32 2147483648, %v3350_v30  ;;  %v1094_v33 = vadd.f32 0.001143296, %v1093_v22  ;;  %v1083_v26 = vadd.f32 0.00028619796, %v1082_v13 }
 0x144   : > { %v3385_v40 = vmul.f32 %v1173_v24, %v3320_v43  ;;  %v1144_v43 = vmul.f32 %v2513_v1, %v3350_v30  ;;  %v836_v24 = vsel %vm3387_vm12, %v835_v56, %v831_v14  ;;  %v3409_v61 = vadd.f32 1.0, %v1021_v9 }
 0x145   : > { %v898_v23 = vadd.f32 0.112945676, %v897_v4  ;;  %vm1149_vm15 = vweird.f32 %v2513_v1  ;;  %v977_v31 = vmul.f32 %v976_v29, %v3301_v8  ;;  %v3413_v50 = vmul.f32 %v1168_v36, %v3197_v54 }
 0x146   : > { %1218 = vadd.xlane.f32.xlu2 %v3385_v40  ;;  %v1145_v16 = vsub.f32 1.0, %v1144_v43  ;;  %v837_v41 = vmul.f32 %v836_v24, %v3294_v6  ;;  %2514 = vrcp.f32 %v3409_v61  ;;  %v956_v3 = vsel %vm3374_vm9, %v955_v57, %v951_v44  ;;  %vm1150_vm0 = vmor %vm1148_vm13, %vm1149_vm15 }
 0x147   : > { %v899_v49 = vmul.f32 %v898_v23, %v3135_v0  ;;  %v1132_v43 = vmul.f32 %v1131_v52, %v3238_v51  ;;  %v1155_v54 = vor.u32 1.1754944e-38, %v1154_v58  ;;  %v1095_v13 = vmul.f32 %v1094_v33, %v3325_v2 }
 0x148   : > { %v1146_v25 = vmul.f32 %v2513_v1, %v1145_v16  ;;  %v978_v36 = vadd.f32 0.112945676, %v977_v31  ;;  %vm1153_vm1 = vcmp.eq.f32.partialorder %v1152_v59, 8.507059e+37  ;;  %v1010_v57 = vmul.f32 %v3323_v20, %v3164_v60 }
 0x149   : > { %v900_v32 = vadd.f32 0.4994258, %v899_v49  ;;  %v2352_v51 = vclamps-f32 %v837_v41, 1.0  ;;  %v1096_v52 = vadd.f32 0.014752088, %v1095_v13  ;;  %v503_v30 = vmul.f32 0.5, %v3225_v53 }
 0x14a   : > { %v1147_v56 = vadd.f32 %v2513_v1, %v1146_v25  ;;  %v979_v60 = vmul.f32 %v978_v36, %v3301_v8  ;;  %vm1028_vm2 = vweird.f32 %v3409_v61  ;;  %v1032_v29 = vand.u32 2147483647, %v3409_v61 }
 0x14b   : > { %v901_v4 = vmul.f32 %v900_v32, %v3135_v0  ;;  %v1097_v59 = vmul.f32 %v1096_v52, %v3325_v2  ;;  %v1167_v22 = vadd.f32 1.0, %v2352_v51  ;;  %v1034_v58 = vand.u32 2147483648, %v3409_v61 }
 0x14c   : > { %v1151_v62 = vsel %vm1150_vm0, %v2513_v1, %v1147_v56  ;;  %v2515_v16 = vpop.eup %2514  ;;  %v957_v1 = vmul.f32 %v956_v3, %v3313_v28  ;;  %v495_v25 = vmul.f32 0.5, %v3044_v35  ;;  %v890_v49 = vmul.f32 %v3307_v55, %v3135_v0 }
 0x14d   : > { %v1156_v44 = vsel %vm1153_vm1, %v1155_v54, %v1151_v62  ;;  %v1024_v14 = vmul.f32 %v2515_v16, %v3409_v61  ;;  %v3441_v53 = vadd.f32 1.0, %v901_v4  ;;  %v1098_v24 = vadd.f32 0.112945676, %v1097_v59 }
 0x14e   : > { %1208 = vadd.xlane.f32.xlu2 %v3413_v50  ;;  %v1157_v18 = vmul.f32 %v1156_v44, %v1132_v43  ;;  %vm1029_vm3 = vweird.f32 %v2515_v16  ;;  %v2355_v56 = vclamps-f32 %v957_v1, 1.0  ;;  %v1035_v35 = vor.u32 1.1754944e-38, %v1034_v58 }
 0x14f   : > { %v1025_v28 = vsub.f32 1.0, %v1024_v14  ;;  %2516 = vrcp.f32 %v3441_v53  ;;  %v1099_v31 = vmul.f32 %v1098_v24, %v3325_v2  ;;  %vm3455_vm4 = vmor %vm1028_vm2, %vm1029_vm3  ;;  %v963_v36 = vadd.f32 0.00028619796, %v3316_v7 }
 0x150   : > { %v2360_v20 = vclamps-f32 %v1157_v18, 1.0  ;;  %v3461_v62 = vmul.f32 %v1167_v22, %v495_v25  ;;  %vm1033_vm5 = vcmp.eq.f32.partialorder %v1032_v29, 8.507059e+37  ;;  %v1170_v52 = vadd.f32 1.0, %v2355_v56 }
 0x151   : > { %v1193_v42 = vpop.xlane.xlu0 %1192  ;;  %v1026_v3 = vmul.f32 %v2515_v16, %v1025_v28  ;;  %v1100_v13 = vadd.f32 0.4994258, %v1099_v31  ;;  %v498_v4 = vmul.f32 0.5, %v3085_v48  ;;  %v964_v59 = vmul.f32 %v963_v36, %v3301_v8 }
 0x152   : > { %v1231_v10 = vmul.f32 %v3395_v37, %v1193_v42  ;;  %v1175_v23 = vadd.f32 1.0, %v2360_v20  ;;  %v1011_v42 = vadd.f32 1.1283791, %v1010_v57  ;;  %v914_v22 = vand.u32 2147483648, %v3441_v53 }
 0x153   : > { %v1027_v32 = vadd.f32 %v2515_v16, %v1026_v3  ;;  %v1101_v61 = vmul.f32 %v1100_v13, %v3325_v2  ;;  %v3480_v14 = vmul.f32 %v1170_v52, %v498_v4  ;;  %vm908_vm6 = vweird.f32 %v3441_v53 }
 0x154   : > { %v3427_v6 = vsub.f32 %v3006_v45, %v1231_v10  ;;  %v1084_v45 = vmul.f32 %v1083_v26, %v3325_v2  ;;  %v980_v26 = vadd.f32 0.4994258, %v979_v60  ;;  %v3448_v41 = vmul.f32 %v1175_v23, %v503_v30 }
 0x155   : > { %v2517_v44 = vpop.eup %2516  ;;  %v1012_v51 = vmul.f32 %v1011_v42, %v3143_v15  ;;  %v1031_v7 = vsel %vm3455_vm4, %v2515_v16, %v1027_v32  ;;  %v1102_v1 = vadd.f32 1.0, %v1101_v61  ;;  %v912_v48 = vand.u32 2147483647, %v3441_v53 }
 0x156   : > { %v1263_v9 = vmul.f32 %v3427_v6, %v3427_v6  ;;  %v1085_v33 = vadd.f32 0.0036580483, %v1084_v45  ;;  %1222 = vadd.xlane.f32.xlu2 %v3448_v41  ;;  %v981_v57 = vmul.f32 %v980_v26, %v3301_v8  ;;  %v1036_v18 = vsel %vm1033_vm5, %v1035_v35, %v1031_v7 }
 0x157   : > { %v1037_v45 = vmul.f32 %v1036_v18, %v1012_v51  ;;  %2518 = vrcp.f32 %v1102_v1  ;;  %vm909_vm7 = vweird.f32 %v2517_v44  ;;  %v500_v58 = vmul.f32 0.5, %v3132_v63 }
 0x158   : > { %1279 = vadd.xlane.f32.xlu0 %v1263_v9  ;;  %v1086_v0 = vmul.f32 %v1085_v33, %v3325_v2  ;;  %v891_v9 = vadd.f32 1.1283791, %v890_v49  ;;  %v3478_v20 = vadd.f32 1.0, %v981_v57  ;;  %v965_v23 = vadd.f32 0.0036580483, %v964_v59  ;;  %vm910_vm8 = vmor %vm908_vm6, %vm909_vm7 }
 0x159   : > { %v2357_v16 = vclamps-f32 %v1037_v45, 1.0  ;;  %v915_v26 = vor.u32 1.1754944e-38, %v914_v22  ;;  %vm913_vm9 = vcmp.eq.f32.partialorder %v912_v48, 8.507059e+37  ;;  %vm1108_vm10 = vweird.f32 %v1102_v1 }
 0x15a   : > { %v1195_v10 = vpop.xlane.xlu0 %1194  ;;  %v1087_v15 = vadd.f32 0.05243302, %v1086_v0  ;;  %2520 = vrcp.f32 %v3478_v20  ;;  %v892_v42 = vmul.f32 %v891_v9, %v3105_v34  ;;  %v966_v49 = vmul.f32 %v965_v23, %v3301_v8 }
 0x15b   : > { %v1232_v43 = vmul.f32 %v3395_v37, %v1195_v10  ;;  %v1172_v24 = vadd.f32 1.0, %v2357_v16  ;;  %v1114_v57 = vand.u32 2147483648, %v1102_v1  ;;  %v1112_v51 = vand.u32 2147483647, %v1102_v1 }
 0x15c   : > { %v1088_v28 = vmul.f32 %v1087_v15, %v3325_v2  ;;  %v967_v0 = vadd.f32 0.05243302, %v966_v49  ;;  %vm988_vm14 = vweird.f32 %v3478_v20 }
 0x15d   : > { %v3465_v55 = vsub.f32 %v3031_v21, %v1232_v43  ;;  %v904_v21 = vmul.f32 %v2517_v44, %v3441_v53  ;;  %v3491_v10 = vmul.f32 %v1172_v24, %v500_v58  ;;  %v2519_v63 = vpop.eup %2518  ;;  %v1115_v9 = vor.u32 1.1754944e-38, %v1114_v57  ;;  %v1574_v57 = vld [vmem:[%s4342_s5 + $0x78] sm:$0xff] }
 0x15e   : > { %1212 = vadd.xlane.f32.xlu2 %v3480_v14  ;;  %v1089_v43 = vadd.f32 0.18741608, %v1088_v28  ;;  %v1104_v35 = vmul.f32 %v2519_v63, %v1102_v1  ;;  %vm1109_vm11 = vweird.f32 %v2519_v63  ;;  %v968_v18 = vmul.f32 %v967_v0, %v3301_v8 }
 0x15f   : > { %v1264_v30 = vmul.f32 %v3465_v55, %v3465_v55  ;;  %v905_v60 = vsub.f32 1.0, %v904_v21  ;;  %vm1110_vm12 = vmor %vm1108_vm10, %vm1109_vm11  ;;  %vm1113_vm13 = vcmp.eq.f32.partialorder %v1112_v51, 8.507059e+37  ;;  %v994_v24 = vand.u32 2147483648, %v3478_v20 }
 0x160   : > { %1206 = vadd.xlane.f32.xlu0 %v3461_v62  ;;  %v2521_v34 = vpop.eup %2520  ;;  %v1105_v32 = vsub.f32 1.0, %v1104_v35  ;;  %v992_v28 = vand.u32 2147483647, %v3478_v20 }
 0x161   : > { %1281 = vadd.xlane.f32.xlu1 %v1264_v30  ;;  %v906_v29 = vmul.f32 %v2517_v44, %v905_v60  ;;  %v984_v52 = vmul.f32 %v2521_v34, %v3478_v20  ;;  %v497_v30 = vmul.f32 0.5, %v3090_v38  ;;  %vm989_vm15 = vweird.f32 %v2521_v34 }
 0x162   : > { %v1197_v25 = vpop.xlane.xlu1 %1196  ;;  %v1106_v61 = vmul.f32 %v2519_v63, %v1105_v32  ;;  %vm990_vm0 = vmor %vm988_vm14, %vm989_vm15  ;;  %vm993_vm1 = vcmp.eq.f32.partialorder %v992_v28, 8.507059e+37 }
 0x163   : > { %v907_v33 = vadd.f32 %v2517_v44, %v906_v29  ;;  %v1233_v31 = vmul.f32 %v3395_v37, %v1197_v25  ;;  %v985_v59 = vsub.f32 1.0, %v984_v52 }
 0x164   : > { %v1107_v7 = vadd.f32 %v2519_v63, %v1106_v61 }
 0x165   : > { %v911_v53 = vsel %vm910_vm8, %v2517_v44, %v907_v33  ;;  %v3494_v56 = vsub.f32 %v3063_v5, %v1233_v31  ;;  %v1090_v5 = vmul.f32 %v1089_v43, %v3325_v2  ;;  %v969_v2 = vadd.f32 0.18741608, %v968_v18  ;;  %v1569_v18 = vld [vmem:[%s4342_s5 + $0x50] sm:$0xff] }
 0x166   : > { %v916_v3 = vsel %vm913_vm9, %v915_v26, %v911_v53  ;;  %v1111_v45 = vsel %vm1110_vm12, %v2519_v63, %v1107_v7  ;;  %v986_v60 = vmul.f32 %v2521_v34, %v985_v59  ;;  %v1571_v7 = vld [vmem:[%s4342_s5 + $0x60] sm:$0xff] }
 0x167   : > { %v917_v54 = vmul.f32 %v916_v3, %v892_v42  ;;  %v1265_v13 = vmul.f32 %v3494_v56, %v3494_v56  ;;  %v1091_v21 = vadd.f32 1.1283791, %v1090_v5  ;;  %v1116_v15 = vsel %vm1113_vm13, %v1115_v9, %v1111_v45  ;;  %v1570_v9 = vld [vmem:[%s4342_s5 + $0x58] sm:$0xff] }
 0x168   : > { %v970_v29 = vmul.f32 %v969_v2, %v3301_v8  ;;  %v987_v58 = vadd.f32 %v2521_v34, %v986_v60  ;;  %v995_v8 = vor.u32 1.1754944e-38, %v994_v24  ;;  %v502_v42 = vmul.f32 0.5, %v3243_v47 }
 0x169   : > { %1216 = vadd.xlane.f32.xlu1 %v3491_v10  ;;  %v2354_v36 = vclamps-f32 %v917_v54, 1.0  ;;  %1283 = vadd.xlane.f32.xlu0 %v1265_v13  ;;  %v1092_v1 = vmul.f32 %v1091_v21, %v3277_v17  ;;  %v1580_v45 = vpack.c.bf16 %v1570_v9, %v1569_v18 }
 0x16a   : > { %v971_v25 = vadd.f32 1.1283791, %v970_v29  ;;  %v991_v33 = vsel %vm990_vm0, %v2521_v34, %v987_v58 }
 0x16b   : > { %v1169_v44 = vadd.f32 1.0, %v2354_v36  ;;  %v1117_v38 = vmul.f32 %v1116_v15, %v1092_v1 }
 0x16c   : > { %v972_v26 = vmul.f32 %v971_v25, %v3228_v27  ;;  %v499_v27 = vmul.f32 0.5, %v3205_v46 }
 0x16d   : > { %v3504_v4 = vmul.f32 %v1169_v44, %v497_v30  ;;  %v2359_v17 = vclamps-f32 %v1117_v38, 1.0  ;;  %v1572_v30 = vld [vmem:[%s4342_s5 + $0x68] sm:$0xff]  ;;  %v1565_v38 = vld [vmem:[%s4342_s5 + $0x30] sm:$0xff] }
 0x16e   : > { %v1581_v21 = vpack.c.bf16 %v1572_v30, %v1571_v7 }
 0x16f   : > { %v1174_v31 = vadd.f32 1.0, %v2359_v17 }
 0x170   : > { %v1199_v16 = vpop.xlane.xlu1 %1198 }
 0x171   : > { %1210 = vadd.xlane.f32.xlu0 %v3504_v4  ;;  %v1234_v22 = vmul.f32 %v3395_v37, %v1199_v16  ;;  %v3521_v3 = vmul.f32 %v1174_v31, %v502_v42  ;;  %v1567_v16 = vld [vmem:[%s4342_s5 + $0x40] sm:$0xff] }
 0x173   : > { %v3511_v48 = vsub.f32 %v3112_v19, %v1234_v22  ;;  %v996_v19 = vsel %vm993_vm1, %v995_v8, %v991_v33  ;;  %v1568_v22 = vld [vmem:[%s4342_s5 + $0x48] sm:$0xff] }
 0x174   : > { %v997_v49 = vmul.f32 %v996_v19, %v972_v26  ;;  %v1579_v24 = vpack.c.bf16 %v1568_v22, %v1567_v16  ;;  %v1559_v16 = vld [vmem:[%s4342_s5] sm:$0xff]  ;;  %v1560_v22 = vld [vmem:[%s4342_s5 + $0x8] sm:$0xff] }
 0x175   : > { %v1266_v23 = vmul.f32 %v3511_v48, %v3511_v48 }
 0x176   : > { %v2356_v54 = vclamps-f32 %v997_v49, 1.0 }
 0x177   : > { %1285 = vadd.xlane.f32.xlu1 %v1266_v23  ;;  %v1566_v23 = vld [vmem:[%s4342_s5 + $0x38] sm:$0xff] }
 0x178   : > { %v1171_v35 = vadd.f32 1.0, %v2356_v54  ;;  %v1578_v33 = vpack.c.bf16 %v1566_v23, %v1565_v38 }
 0x17a   : > { %v1201_v53 = vpop.xlane.xlu2 %1200  ;;  %v3530_v47 = vmul.f32 %v1171_v35, %v499_v27 }
 0x17b   : > { %v1235_v63 = vmul.f32 %v3395_v37, %v1201_v53 }
 0x17d   : > { %v3524_v20 = vsub.f32 %v3147_v39, %v1235_v63 }
 0x17f   : > { %1220 = vadd.xlane.f32.xlu1 %v3521_v3  ;;  %v1267_v43 = vmul.f32 %v3524_v20, %v3524_v20 }
 0x181   : > { %1287 = vadd.xlane.f32.xlu0 %v1267_v43 }
 0x186   : > { %v1203_v13 = vpop.xlane.xlu2 %1202 }
 0x187   : > { %v1236_v34 = vmul.f32 %v3395_v37, %v1203_v13 }
 0x189   : > { %1214 = vadd.xlane.f32.xlu0 %v3530_v47  ;;  %v3535_v39 = vsub.f32 %v3192_v12, %v1236_v34  ;;  %v1573_v12 = vld [vmem:[%s4342_s5 + $0x70] sm:$0xff] }
 0x18a   : > { %v1582_v51 = vpack.c.bf16 %v1574_v57, %v1573_v12  ;;  %v1562_v57 = vld [vmem:[%s4342_s5 + $0x18] sm:$0xff] }
 0x18b   : > { %v1268_v36 = vmul.f32 %v3535_v39, %v3535_v39 }
 0x18c   : > { %1595 = vmatpush.bf16.msra.mxu1 %v1582_v51  ;;  %2418 = vmatpush.bf16.msra.mxu3 %v1582_v51 }
 0x18d   : > { %1289 = vadd.xlane.f32.xlu1 %v1268_v36 }
 0x190   : > { %1596 = vmatpush.bf16.msra.mxu1 %v1581_v21  ;;  %2419 = vmatpush.bf16.msra.mxu3 %v1581_v21 }
 0x194   : > { %1597 = vmatpush.bf16.msra.mxu1 %v1580_v45  ;;  %2420 = vmatpush.bf16.msra.mxu3 %v1580_v45 }
 0x198   : > { %1598 = vmatpush.bf16.msra.mxu1 %v1579_v24  ;;  %2421 = vmatpush.bf16.msra.mxu3 %v1579_v24  ;;  %v1575_v24 = vpack.c.bf16 %v1560_v22, %v1559_v16 }
 0x19c   : > { %1599 = vmatpush.bf16.msra.mxu1 %v1578_v33  ;;  %2422 = vmatpush.bf16.msra.mxu3 %v1578_v33 }
 0x19d   : > { %v1205_v32 = vpop.xlane.xlu2 %1204 }
 0x19e   : > { %v1237_v0 = vmul.f32 %v3395_v37, %v1205_v32 }
 0x1a0   : > { %v3541_v5 = vsub.f32 %v3283_v11, %v1237_v0 }
 0x1a2   : > { %v1269_v46 = vmul.f32 %v3541_v5, %v3541_v5 }
 0x1a4   : > { %1291 = vadd.xlane.f32.xlu1 %v1269_v46  ;;  %v1564_v46 = vld [vmem:[%s4342_s5 + $0x28] sm:$0xff] }
 0x1b9   : > { %v1219_v61 = vpop.xlane.xlu2 %1218 }
 0x1ba   : > { %v1244_v44 = vmul.f32 %v3395_v37, %v1219_v61  ;;  %v1561_v61 = vld [vmem:[%s4342_s5 + $0x10] sm:$0xff] }
 0x1bc   : > { %v3553_v52 = vsub.f32 %v3385_v40, %v1244_v44 }
 0x1be   : > { %v1276_v11 = vmul.f32 %v3553_v52, %v3553_v52 }
 0x1c0   : > { %1305 = vadd.xlane.f32.xlu1 %v1276_v11  ;;  %v1576_v11 = vpack.c.bf16 %v1562_v57, %v1561_v61 }
 0x1c1   : > { %v1209_v15 = vpop.xlane.xlu2 %1208 }
 0x1c2   : > { %v1239_v28 = vmul.f32 %v3395_v37, %v1209_v15 }
 0x1c4   : > { %v3596_v31 = vsub.f32 %v3413_v50, %v1239_v28  ;;  %v3659_v28 = vld [vmem:[%s4341_s4] ss:$0 sm:$0xff] }
 0x1c6   : > { %v1271_v49 = vmul.f32 %v3596_v31, %v3596_v31 }
 0x1c9   : > { %v1223_v19 = vpop.xlane.xlu2 %1222 }
 0x1ca   : > { %v1246_v63 = vmul.f32 %v3395_v37, %v1223_v19 }
 0x1cb   : > { %v1280_v40 = vpop.xlane.xlu0 %1279 }
 0x1cc   : > { %v1311_v59 = vmul.f32 %v1280_v40, %v3395_v37  ;;  %v3611_v34 = vsub.f32 %v3448_v41, %v1246_v63 }
 0x1ce   : > { %v3570_v2 = vadd.f32 1e-06, %v1311_v59  ;;  %v1278_v41 = vmul.f32 %v3611_v34, %v3611_v34 }
 0x1d0   : > { %2522 = vrsqrt.f32 %v3570_v2  ;;  %vm1349_vm4 = vweird.f32 %v3570_v2 }
 0x1d1   : > { %v1213_v30 = vpop.xlane.xlu2 %1212 }
 0x1d2   : > { %v1241_v21 = vmul.f32 %v3395_v37, %v1213_v30 }
 0x1d3   : > { %v1207_v1 = vpop.xlane.xlu0 %1206 }
 0x1d4   : > { %v1238_v60 = vmul.f32 %v3395_v37, %v1207_v1  ;;  %v1282_v29 = vpop.xlane.xlu1 %1281 }
 0x1d5   : > { %v1312_v17 = vmul.f32 %v1282_v29, %v3395_v37  ;;  %v3651_v29 = vld [vmem:[%s4340_s3] ss:$0 sm:$0xff] }
 0x1d6   : > { %v3584_v58 = vsub.f32 %v3461_v62, %v1238_v60  ;;  %v3593_v62 = vpop.eup %2522 }
 0x1d7   : > { %v1328_v8 = vadd.f32 1e-06, %v1312_v17  ;;  %v1344_v42 = vmul.f32 %v3593_v62, %v3570_v2  ;;  %vm1350_vm2 = vweird.f32 %v3593_v62 }
 0x1d8   : > { %v1270_v25 = vmul.f32 %v3584_v58, %v3584_v58  ;;  %vm1351_vm5 = vmor %vm1349_vm4, %vm1350_vm2 }
 0x1d9   : > { %2524 = vrsqrt.f32 %v1328_v8  ;;  %v1345_v27 = vmul.f32 %v3593_v62, %v1344_v42  ;;  %vm1359_vm6 = vweird.f32 %v1328_v8 }
 0x1da   : > { %1293 = vadd.xlane.f32.xlu2 %v1270_v25 }
 0x1db   : > { %v1346_v32 = vmul.f32 0.5, %v1345_v27 }
 0x1dc   : > { %v1217_v26 = vpop.xlane.xlu1 %1216  ;;  %v1284_v50 = vpop.xlane.xlu0 %1283 }
 0x1dd   : > { %v1243_v53 = vmul.f32 %v3395_v37, %v1217_v26  ;;  %v1347_v7 = vsub.f32 1.5, %v1346_v32  ;;  %v1313_v15 = vmul.f32 %v1284_v50, %v3395_v37 }
 0x1df   : > { %v2525_v43 = vpop.eup %2524  ;;  %v3605_v54 = vsub.f32 %v3491_v10, %v1243_v53  ;;  %v1563_v10 = vld [vmem:[%s4342_s5 + $0x20] sm:$0xff]  ;;  %v1348_v45 = vmul.f32 %v3593_v62, %v1347_v7  ;;  %v1329_v1 = vadd.f32 1e-06, %v1313_v15 }
 0x1e0   : > { %v1354_v35 = vmul.f32 %v2525_v43, %v1328_v8  ;;  %v1577_v12 = vpack.c.bf16 %v1564_v46, %v1563_v10  ;;  %vm1360_vm3 = vweird.f32 %v2525_v43 }
 0x1e1   : > { %v1275_v13 = vmul.f32 %v3605_v54, %v3605_v54  ;;  %vm1361_vm7 = vmor %vm1359_vm6, %vm1360_vm3  ;;  %v1352_v38 = vsel %vm1351_vm5, %v3593_v62, %v1348_v45  ;;  %2526 = vrsqrt.f32 %v1329_v1  ;;  %vm1369_vm10 = vweird.f32 %v1329_v1 }
 0x1e2   : > { %1295 = vadd.xlane.f32.xlu2 %v1271_v49  ;;  %v1355_v36 = vmul.f32 %v2525_v43, %v1354_v35  ;;  %1600 = vmatpush.bf16.msra.mxu1 %v1577_v12  ;;  %v1503_v23 = vmul.f32 %v1352_v38, %v3427_v6 }
 0x1e3   : > { %1303 = vadd.xlane.f32.xlu0 %v1275_v13  ;;  %2423 = vmatpush.bf16.msra.mxu3 %v1577_v12 }
 0x1e4   : > { %v1356_v0 = vmul.f32 0.5, %v1355_v36  ;;  %v1211_v44 = vpop.xlane.xlu0 %1210  ;;  %v1523_v33 = vmul.f32 %v3651_v29, %v1503_v23 }
 0x1e5   : > { %v1240_v51 = vmul.f32 %v3395_v37, %v1211_v44 }
 0x1e6   : > { %v1357_v18 = vsub.f32 1.5, %v1356_v0  ;;  %1601 = vmatpush.bf16.msra.mxu1 %v1576_v11  ;;  %v1543_v6 = vadd.f32 %v3659_v28, %v1523_v33 }
 0x1e7   : > { %v3629_v40 = vsub.f32 %v3504_v4, %v1240_v51  ;;  %2424 = vmatpush.bf16.msra.mxu3 %v1576_v11  ;;  %v3639_v4 = vsub.f32 %v3480_v14, %v1241_v21  ;;  %v2527_v53 = vpop.eup %2526 }
 0x1e8   : > { %v1358_v59 = vmul.f32 %v2525_v43, %v1357_v18  ;;  %v1364_v27 = vmul.f32 %v2527_v53, %v1329_v1  ;;  %vm1370_vm8 = vweird.f32 %v2527_v53 }
 0x1e9   : > { %v1272_v9 = vmul.f32 %v3629_v40, %v3629_v40  ;;  %v1273_v62 = vmul.f32 %v3639_v4, %v3639_v4  ;;  %vm1371_vm11 = vmor %vm1369_vm10, %vm1370_vm8 }
 0x1ea   : > { %1309 = vadd.xlane.f32.xlu2 %v1278_v41  ;;  %v1286_v60 = vpop.xlane.xlu1 %1285  ;;  %v1362_v2 = vsel %vm1361_vm7, %v2525_v43, %v1358_v59  ;;  %1602 = vmatpush.bf16.msra.mxu1 %v1575_v24  ;;  %v1365_v32 = vmul.f32 %v2527_v53, %v1364_v27 }
 0x1eb   : > { %1297 = vadd.xlane.f32.xlu0 %v1272_v9  ;;  %v1314_v14 = vmul.f32 %v1286_v60, %v3395_v37  ;;  %v1504_v17 = vmul.f32 %v1362_v2, %v3465_v55  ;;  %2425 = vmatpush.bf16.msra.mxu3 %v1575_v24 }
 0x1ec   : > { %v1366_v61 = vmul.f32 0.5, %v1365_v32 }
 0x1ed   : > { %v1330_v25 = vadd.f32 1e-06, %v1314_v14  ;;  %v1524_v8 = vmul.f32 %v3651_v29, %v1504_v17 }
 0x1ee   : > { %v1367_v51 = vsub.f32 1.5, %v1366_v61 }
 0x1ef   : > { %2528 = vrsqrt.f32 %v1330_v25  ;;  %v1544_v55 = vadd.f32 %v3659_v28, %v1524_v8  ;;  %vm1379_vm12 = vweird.f32 %v1330_v25 }
 0x1f0   : > { %v1368_v9 = vmul.f32 %v2527_v53, %v1367_v51 }
 0x1f1   : > { %v1583_v19 = vpack.c.bf16 %v1544_v55, %v1543_v6 }
 0x1f2   : > { %v1221_v26 = vpop.xlane.xlu1 %1220  ;;  %v1372_v15 = vsel %vm1371_vm11, %v2527_v53, %v1368_v9 }
 0x1f3   : > { %1299 = vadd.xlane.f32.xlu0 %v1273_v62  ;;  %v1245_v42 = vmul.f32 %v3395_v37, %v1221_v26  ;;  %1603 = vmatmul.bf16.vlgmr.msra.gmra.mxu1 %v1583_v19  ;;  %v1505_v16 = vmul.f32 %v1372_v15, %v3494_v56 }
 0x1f4   : > { %v1288_v43 = vpop.xlane.xlu0 %1287 }
 0x1f5   : > { %v2529_v63 = vpop.eup %2528  ;;  %v3669_v49 = vsub.f32 %v3521_v3, %v1245_v42  ;;  %v1315_v50 = vmul.f32 %v1288_v43, %v3395_v37  ;;  %v1525_v2 = vmul.f32 %v3651_v29, %v1505_v16 }
 0x1f6   : > { %v1374_v13 = vmul.f32 %v2529_v63, %v1330_v25  ;;  %vm1380_vm9 = vweird.f32 %v2529_v63 }
 0x1f7   : > { %v1277_v35 = vmul.f32 %v3669_v49, %v3669_v49  ;;  %v1331_v36 = vadd.f32 1e-06, %v1315_v50  ;;  %vm1381_vm13 = vmor %vm1379_vm12, %vm1380_vm9  ;;  %v1545_v1 = vadd.f32 %v3659_v28, %v1525_v2 }
 0x1f8   : > { %v1375_v0 = vmul.f32 %v2529_v63, %v1374_v13 }
 0x1f9   : > { %1307 = vadd.xlane.f32.xlu1 %v1277_v35  ;;  %2530 = vrsqrt.f32 %v1331_v36  ;;  %vm1389_vm15 = vweird.f32 %v1331_v36 }
 0x1fa   : > { %v1376_v12 = vmul.f32 0.5, %v1375_v0 }
 0x1fc   : > { %v1215_v10 = vpop.xlane.xlu0 %1214  ;;  %v1377_v11 = vsub.f32 1.5, %v1376_v12 }
 0x1fd   : > { %v1242_v46 = vmul.f32 %v3395_v37, %v1215_v10 }
 0x1fe   : > { %v1378_v45 = vmul.f32 %v2529_v63, %v1377_v11 }
 0x1ff   : > { %v2531_v3 = vpop.eup %2530  ;;  %v3676_v41 = vsub.f32 %v3530_v47, %v1242_v46 }
 0x200   : > { %v1384_v57 = vmul.f32 %v2531_v3, %v1331_v36  ;;  %v1290_v30 = vpop.xlane.xlu1 %1289  ;;  %v1382_v60 = vsel %vm1381_vm13, %v2529_v63, %v1378_v45  ;;  %vm1390_vm14 = vweird.f32 %v2531_v3  ;;  %v1659_v36 = vld [vmem:[%s4344_s7 + $0x78] sm:$0xff] }
 0x201   : > { %v1274_v44 = vmul.f32 %v3676_v41, %v3676_v41  ;;  %v1316_v18 = vmul.f32 %v1290_v30, %v3395_v37  ;;  %v1506_v22 = vmul.f32 %v1382_v60, %v3511_v48  ;;  %vm1391_vm0 = vmor %vm1389_vm15, %vm1390_vm14  ;;  %v1657_v30 = vld [vmem:[%s4344_s7 + $0x68] sm:$0xff] }
 0x202   : > { %v1385_v7 = vmul.f32 %v2531_v3, %v1384_v57 }
 0x203   : > { %1301 = vadd.xlane.f32.xlu1 %v1274_v44  ;;  %v1332_v21 = vadd.f32 1e-06, %v1316_v18  ;;  %v1526_v14 = vmul.f32 %v3651_v29, %v1506_v22  ;;  %v1654_v18 = vld [vmem:[%s4344_s7 + $0x50] sm:$0xff] }
 0x204   : > { %v1386_v59 = vmul.f32 0.5, %v1385_v7  ;;  %v1656_v7 = vld [vmem:[%s4344_s7 + $0x60] sm:$0xff] }
 0x205   : > { %2532 = vrsqrt.f32 %v1332_v21  ;;  %v1546_v17 = vadd.f32 %v3659_v28, %v1526_v14  ;;  %vm1399_vm2 = vweird.f32 %v1332_v21 }
 0x206   : > { %v1387_v47 = vsub.f32 1.5, %v1386_v59  ;;  %v1666_v59 = vpack.c.bf16 %v1657_v30, %v1656_v7 }
 0x207   : > { %v1584_v33 = vpack.c.bf16 %v1546_v17, %v1545_v1 }
 0x208   : > { %v1388_v24 = vmul.f32 %v2531_v3, %v1387_v47  ;;  %v1655_v47 = vld [vmem:[%s4344_s7 + $0x58] sm:$0xff] }
 0x209   : > { %1608 = vmatmul.bf16.gmra.mxu1 %v1584_v33  ;;  %v1665_v16 = vpack.c.bf16 %v1655_v47, %v1654_v18 }
 0x20a   : > { %v1392_v56 = vsel %vm1391_vm0, %v2531_v3, %v1388_v24 }
 0x20b   : > { %v2533_v38 = vpop.eup %2532  ;;  %v1507_v62 = vmul.f32 %v1392_v56, %v3524_v20 }
 0x20c   : > { %v1394_v23 = vmul.f32 %v2533_v38, %v1332_v21  ;;  %vm1400_vm1 = vweird.f32 %v2533_v38 }
 0x20d   : > { %vm1401_vm3 = vmor %vm1399_vm2, %vm1400_vm1  ;;  %v1527_v26 = vmul.f32 %v3651_v29, %v1507_v62 }
 0x20e   : > { %v1395_v25 = vmul.f32 %v2533_v38, %v1394_v23 }
 0x20f   : > { %v1547_v53 = vadd.f32 %v3659_v28, %v1527_v26 }
 0x210   : > { %v1396_v8 = vmul.f32 0.5, %v1395_v25 }
 0x212   : > { %v1397_v48 = vsub.f32 1.5, %v1396_v8 }
 0x214   : > { %v1398_v6 = vmul.f32 %v2533_v38, %v1397_v48 }
 0x216   : > { %v1402_v55 = vsel %vm1401_vm3, %v2533_v38, %v1398_v6 }
 0x217   : > { %v1508_v19 = vmul.f32 %v1402_v55, %v3535_v39  ;;  %v1292_v50 = vpop.xlane.xlu1 %1291  ;;  %v1658_v39 = vld [vmem:[%s4344_s7 + $0x70] sm:$0xff] }
 0x218   : > { %v1317_v35 = vmul.f32 %v1292_v50, %v3395_v37  ;;  %v1667_v0 = vpack.c.bf16 %v1659_v36, %v1658_v39  ;;  %v1652_v39 = vld [vmem:[%s4344_s7 + $0x40] sm:$0xff]  ;;  %v1653_v36 = vld [vmem:[%s4344_s7 + $0x48] sm:$0xff] }
 0x219   : > { %v1528_v42 = vmul.f32 %v3651_v29, %v1508_v19 }
 0x21a   : > { %v1333_v20 = vadd.f32 1e-06, %v1317_v35  ;;  %1680 = vmatpush.bf16.msra.mxu2 %v1667_v0  ;;  %2426 = vmatpush.bf16.msrb.mxu3 %v1667_v0  ;;  %v1664_v0 = vpack.c.bf16 %v1653_v36, %v1652_v39  ;;  %v1644_v39 = vld [vmem:[%s4344_s7] sm:$0xff] }
 0x21b   : > { %v1548_v63 = vadd.f32 %v3659_v28, %v1528_v42 }
 0x21c   : > { %2534 = vrsqrt.f32 %v1333_v20  ;;  %vm1409_vm5 = vweird.f32 %v1333_v20 }
 0x21d   : > { %v1585_v43 = vpack.c.bf16 %v1548_v63, %v1547_v53 }
 0x21e   : > { %1681 = vmatpush.bf16.msra.mxu2 %v1666_v59  ;;  %2427 = vmatpush.bf16.msrb.mxu3 %v1666_v59 }
 0x21f   : > { %1613 = vmatmul.bf16.gmra.mxu1 %v1585_v43 }
 0x222   : > { %v3694_v13 = vpop.eup %2534  ;;  %1682 = vmatpush.bf16.msra.mxu2 %v1665_v16  ;;  %2428 = vmatpush.bf16.msrb.mxu3 %v1665_v16 }
 0x223   : > { %v1404_v61 = vmul.f32 %v3694_v13, %v1333_v20  ;;  %vm1410_vm4 = vweird.f32 %v3694_v13 }
 0x224   : > { %vm1411_vm6 = vmor %vm1409_vm5, %vm1410_vm4 }
 0x225   : > { %v1405_v57 = vmul.f32 %v3694_v13, %v1404_v61  ;;  %v1651_v61 = vld [vmem:[%s4344_s7 + $0x38] sm:$0xff] }
 0x226   : > { %1683 = vmatpush.bf16.msra.mxu2 %v1664_v0  ;;  %2429 = vmatpush.bf16.msrb.mxu3 %v1664_v0 }
 0x227   : > { %v1406_v11 = vmul.f32 0.5, %v1405_v57 }
 0x229   : > { %v1407_v22 = vsub.f32 1.5, %v1406_v11 }
 0x22b   : > { %v1408_v1 = vmul.f32 %v3694_v13, %v1407_v22 }
 0x22d   : > { %v1412_v19 = vsel %vm1411_vm6, %v3694_v13, %v1408_v1 }
 0x22e   : > { %v1509_v35 = vmul.f32 %v1412_v19, %v3541_v5  ;;  %v1650_v5 = vld [vmem:[%s4344_s7 + $0x30] sm:$0xff] }
 0x22f   : > { %v1663_v11 = vpack.c.bf16 %v1651_v61, %v1650_v5 }
 0x231   : > { %1684 = vmatpush.bf16.msra.mxu2 %v1663_v11  ;;  %2430 = vmatpush.bf16.msrb.mxu3 %v1663_v11 }
 0x233   : > { %v1306_v27 = vpop.xlane.xlu1 %1305 }
 0x234   : > { %v1324_v10 = vmul.f32 %v1306_v27, %v3395_v37 }
 0x236   : > { %v3705_v3 = vadd.f32 1e-06, %v1324_v10 }
 0x238   : > { %vm1479_vm10 = vweird.f32 %v3705_v3 }
 0x24d   : > { %v1294_v32 = vpop.xlane.xlu2 %1293 }
 0x24e   : > { %v1318_v46 = vmul.f32 %v1294_v32, %v3395_v37 }
 0x250   : > { %v1334_v12 = vadd.f32 1e-06, %v1318_v46  ;;  %v1529_v46 = vmul.f32 %v3651_v29, %v1509_v35 }
 0x252   : > { %2536 = vrsqrt.f32 %v1334_v12  ;;  %vm1419_vm8 = vweird.f32 %v1334_v12 }
 0x253   : > { %2538 = vrsqrt.f32 %v3705_v3 }
 0x255   : > { %v1296_v44 = vpop.xlane.xlu2 %1295 }
 0x256   : > { %v1319_v51 = vmul.f32 %v1296_v44, %v3395_v37  ;;  %v1304_v45 = vpop.xlane.xlu0 %1303 }
 0x257   : > { %v1323_v60 = vmul.f32 %v1304_v45, %v3395_v37 }
 0x258   : > { %v2537_v21 = vpop.eup %2536  ;;  %v3719_v9 = vadd.f32 1e-06, %v1319_v51 }
 0x259   : > { %v1414_v15 = vmul.f32 %v2537_v21, %v1334_v12  ;;  %v3726_v2 = vadd.f32 1e-06, %v1323_v60  ;;  %v3728_v14 = vpop.eup %2538  ;;  %vm1420_vm7 = vweird.f32 %v2537_v21 }
 0x25a   : > { %2540 = vrsqrt.f32 %v3719_v9  ;;  %v1474_v17 = vmul.f32 %v3728_v14, %v3705_v3  ;;  %vm1421_vm9 = vmor %vm1419_vm8, %vm1420_vm7  ;;  %vm1480_vm11 = vweird.f32 %v3728_v14  ;;  %vm1429_vm15 = vweird.f32 %v3719_v9 }
 0x25b   : > { %v1415_v38 = vmul.f32 %v2537_v21, %v1414_v15  ;;  %2542 = vrsqrt.f32 %v3726_v2  ;;  %vm3788_vm14 = vmor %vm1479_vm10, %vm1480_vm11  ;;  %vm1469_vm1 = vweird.f32 %v3726_v2 }
 0x25c   : > { %v1475_v62 = vmul.f32 %v3728_v14, %v1474_v17 }
 0x25d   : > { %v1416_v24 = vmul.f32 0.5, %v1415_v38  ;;  %v1310_v23 = vpop.xlane.xlu2 %1309 }
 0x25e   : > { %v1326_v25 = vmul.f32 %v1310_v23, %v3395_v37  ;;  %v1298_v55 = vpop.xlane.xlu0 %1297  ;;  %v1476_v20 = vmul.f32 0.5, %v1475_v62 }
 0x25f   : > { %v1417_v8 = vsub.f32 1.5, %v1416_v24  ;;  %v1320_v42 = vmul.f32 %v1298_v55, %v3395_v37 }
 0x260   : > { %v3736_v33 = vpop.eup %2540  ;;  %v3743_v6 = vadd.f32 1e-06, %v1326_v25  ;;  %v1477_v12 = vsub.f32 1.5, %v1476_v20 }
 0x261   : > { %v1424_v56 = vmul.f32 %v3736_v33, %v3719_v9  ;;  %v3740_v48 = vpop.eup %2542  ;;  %v1418_v53 = vmul.f32 %v2537_v21, %v1417_v8  ;;  %v3751_v50 = vadd.f32 1e-06, %v1320_v42  ;;  %vm1430_vm12 = vweird.f32 %v3736_v33  ;;  %v1648_v9 = vld [vmem:[%s4344_s7 + $0x20] sm:$0xff] }
 0x262   : > { %v1464_v26 = vmul.f32 %v3740_v48, %v3726_v2  ;;  %2544 = vrsqrt.f32 %v3743_v6  ;;  %v1478_v59 = vmul.f32 %v3728_v14, %v1477_v12  ;;  %vm1470_vm13 = vweird.f32 %v3740_v48  ;;  %vm3793_vm0 = vmor %vm1429_vm15, %vm1430_vm12 }
 0x263   : > { %v1425_v63 = vmul.f32 %v3736_v33, %v1424_v56  ;;  %2546 = vrsqrt.f32 %v3751_v50  ;;  %v1422_v32 = vsel %vm1421_vm9, %v2537_v21, %v1418_v53  ;;  %v1549_v21 = vadd.f32 %v3659_v28, %v1529_v46  ;;  %vm1471_vm2 = vmor %vm1469_vm1, %vm1470_vm13  ;;  %v1649_v56 = vld [vmem:[%s4344_s7 + $0x28] sm:$0xff] }
 0x264   : > { %v1465_v43 = vmul.f32 %v3740_v48, %v1464_v26  ;;  %v1510_v10 = vmul.f32 %v1422_v32, %v3584_v58  ;;  %v1482_v2 = vsel %vm3788_vm14, %v3728_v14, %v1478_v59  ;;  %v3817_v26 = vld [vmem:[%s4343_s6] ss:$0 sm:$0xff]  ;;  %v1662_v42 = vpack.c.bf16 %v1649_v56, %v1648_v9  ;;  %v1646_v14 = vld [vmem:[%s4344_s7 + $0x10] sm:$0xff] }
 0x265   : > { %v1426_v27 = vmul.f32 0.5, %v1425_v63  ;;  %vm1439_vm4 = vweird.f32 %v3751_v50  ;;  %vm1499_vm7 = vweird.f32 %v3743_v6 }
 0x266   : > { %v1466_v13 = vmul.f32 0.5, %v1465_v43  ;;  %v1300_v57 = vpop.xlane.xlu0 %1299  ;;  %v1530_v51 = vmul.f32 %v3651_v29, %v1510_v10  ;;  %1685 = vmatpush.bf16.msra.mxu2 %v1662_v42  ;;  %2431 = vmatpush.bf16.msrb.mxu3 %v1662_v42 }
 0x267   : > { %v1321_v44 = vmul.f32 %v1300_v57, %v3395_v37  ;;  %v1427_v30 = vsub.f32 1.5, %v1426_v27 }
 0x268   : > { %v3772_v7 = vpop.eup %2544  ;;  %v1467_v18 = vsub.f32 1.5, %v1466_v13  ;;  %v1550_v45 = vadd.f32 %v3659_v28, %v1530_v51 }
 0x269   : > { %v2547_v58 = vpop.eup %2546  ;;  %v1494_v15 = vmul.f32 %v3772_v7, %v3743_v6  ;;  %v3783_v60 = vadd.f32 1e-06, %v1321_v44  ;;  %v1428_v22 = vmul.f32 %v3736_v33, %v1427_v30  ;;  %vm1500_vm6 = vweird.f32 %v3772_v7 }
 0x26a   : > { %v1434_v47 = vmul.f32 %v2547_v58, %v3751_v50  ;;  %v1586_v16 = vpack.c.bf16 %v1550_v45, %v1549_v21  ;;  %v1468_v38 = vmul.f32 %v3740_v48, %v1467_v18  ;;  %vm1440_vm3 = vweird.f32 %v2547_v58  ;;  %v1645_v50 = vld [vmem:[%s4344_s7 + $0x8] sm:$0xff]  ;;  %vm1501_vm8 = vmor %vm1499_vm7, %vm1500_vm6 }
 0x26b   : > { %v1495_v17 = vmul.f32 %v3772_v7, %v1494_v15  ;;  %2548 = vrsqrt.f32 %v3783_v60  ;;  %v1432_v55 = vsel %vm3793_vm0, %v3736_v33, %v1428_v22  ;;  %v1647_v33 = vld [vmem:[%s4344_s7 + $0x18] sm:$0xff]  ;;  %vm3829_vm5 = vmor %vm1439_vm4, %vm1440_vm3  ;;  %v1660_v44 = vpack.c.bf16 %v1645_v50, %v1644_v39 }
 0x26c   : > { %v1435_v3 = vmul.f32 %v2547_v58, %v1434_v47  ;;  %1618 = vmatmul.bf16.gmra.mxu1 %v1586_v16  ;;  %v1308_v8 = vpop.xlane.xlu1 %1307  ;;  %v1472_v62 = vsel %vm1471_vm2, %v3740_v48, %v1468_v38  ;;  %v1516_v48 = vmul.f32 %v1482_v2, %v3553_v52  ;;  %v1661_v20 = vpack.c.bf16 %v1647_v33, %v1646_v14 }
 0x26d   : > { %v1325_v19 = vmul.f32 %v1308_v8, %v3395_v37  ;;  %v1515_v53 = vmul.f32 %v1472_v62, %v3605_v54  ;;  %v1496_v27 = vmul.f32 0.5, %v1495_v17  ;;  %v1511_v32 = vmul.f32 %v1432_v55, %v3596_v31 }
 0x26e   : > { %v1436_v1 = vmul.f32 0.5, %v1435_v3  ;;  %v1536_v54 = vmul.f32 %v3651_v29, %v1516_v48  ;;  %1686 = vmatpush.bf16.msra.mxu2 %v1661_v20  ;;  %2432 = vmatpush.bf16.msrb.mxu3 %v1661_v20  ;;  %vm1449_vm13 = vweird.f32 %v3783_v60 }
 0x26f   : > { %v1341_v35 = vadd.f32 1e-06, %v1325_v19  ;;  %v1535_v52 = vmul.f32 %v3651_v29, %v1515_v53  ;;  %v1531_v12 = vmul.f32 %v3651_v29, %v1511_v32  ;;  %v1497_v31 = vsub.f32 1.5, %v1496_v27 }
 0x270   : > { %v1437_v25 = vsub.f32 1.5, %v1436_v1  ;;  %v1604_v13 = vpop.f32.mrf.mxu1  ;;  %v1556_v46 = vadd.f32 %v3659_v28, %v1536_v54 }
 0x271   : > { %v3844_v5 = vpop.eup %2548  ;;  %2550 = vrsqrt.f32 %v1341_v35  ;;  %v3847_v0 = vadd.f32 %v3817_v26, %v1604_v13  ;;  %v1555_v10 = vadd.f32 %v3659_v28, %v1535_v52  ;;  %v1551_v18 = vadd.f32 %v3659_v28, %v1531_v12 }
 0x272   : > { %v1438_v63 = vmul.f32 %v2547_v58, %v1437_v25  ;;  %v1444_v51 = vmul.f32 %v3844_v5, %v3783_v60  ;;  %1687 = vmatpush.bf16.msra.mxu2 %v1660_v44  ;;  %2433 = vmatpush.bf16.msrb.mxu3 %v1660_v44  ;;  %v1498_v21 = vmul.f32 %v3772_v7, %v1497_v31  ;;  %vm1489_vm10 = vweird.f32 %v1341_v35 }
 0x273   : > { %v1924_v57 = vmul.f32 %v3847_v0, %v3847_v0  ;;  %v1589_v11 = vpack.c.bf16 %v1556_v46, %v1555_v10  ;;  %vm1450_vm12 = vweird.f32 %v3844_v5 }
 0x274   : > { %v1442_v36 = vsel %vm3829_vm5, %v2547_v58, %v1438_v63  ;;  %v1445_v59 = vmul.f32 %v3844_v5, %v1444_v51  ;;  %v1502_v8 = vsel %vm1501_vm8, %v3772_v7, %v1498_v21  ;;  %vm1451_vm14 = vmor %vm1449_vm13, %vm1450_vm12 }
 0x275   : > { %v1512_v61 = vmul.f32 %v1442_v36, %v3629_v40  ;;  %1940 = vadd.xlane.f32.xlu2 %v1924_v57  ;;  %1633 = vmatmul.bf16.vlgmr.msra.gmra.mxu3 %v1589_v11  ;;  %v1518_v6 = vmul.f32 %v1502_v8, %v3611_v34 }
 0x276   : > { %v1302_v47 = vpop.xlane.xlu1 %1301  ;;  %v1446_v25 = vmul.f32 0.5, %v1445_v59 }
 0x277   : > { %v1532_v30 = vmul.f32 %v3651_v29, %v1512_v61  ;;  %v2551_v58 = vpop.eup %2550  ;;  %v1322_v22 = vmul.f32 %v1302_v47, %v3395_v37  ;;  %v1538_v19 = vmul.f32 %v3651_v29, %v1518_v6 }
 0x278   : > { %v1484_v45 = vmul.f32 %v2551_v58, %v1341_v35  ;;  %v1606_v15 = vpop.f32.mrf.mxu1  ;;  %vm1490_vm9 = vweird.f32 %v2551_v58  ;;  %v1447_v56 = vsub.f32 1.5, %v1446_v25 }
 0x279   : > { %v1552_v40 = vadd.f32 %v3659_v28, %v1532_v30  ;;  %v3865_v38 = vadd.f32 %v3817_v26, %v1606_v15  ;;  %v1338_v24 = vadd.f32 1e-06, %v1322_v22  ;;  %vm1491_vm11 = vmor %vm1489_vm10, %vm1490_vm9  ;;  %v1558_v14 = vadd.f32 %v3659_v28, %v1538_v19 }
 0x27a   : > { %v1485_v3 = vmul.f32 %v2551_v58, %v1484_v45  ;;  %v1448_v42 = vmul.f32 %v3844_v5, %v1447_v56 }
 0x27b   : > { %v1587_v16 = vpack.c.bf16 %v1552_v40, %v1551_v18  ;;  %v1668_v23 = vpack.c.bf16 %v3865_v38, %v3847_v0  ;;  %v1925_v1 = vmul.f32 %v3865_v38, %v3865_v38  ;;  %2552 = vrsqrt.f32 %v1338_v24 }
 0x27c   : > { %v1486_v17 = vmul.f32 0.5, %v1485_v3  ;;  %vm1459_vm0 = vweird.f32 %v1338_v24 }
 0x27d   : > { %1623 = vmatmul.bf16.gmra.mxu1 %v1587_v16  ;;  %1688 = vmatmul.bf16.vlgmr.msra.gmra.mxu2 %v1668_v23 }
 0x27e   : > { %1942 = vadd.xlane.f32.xlu0 %v1925_v1  ;;  %v1487_v37 = vsub.f32 1.5, %v1486_v17 }
 0x280   : > { %v1488_v9 = vmul.f32 %v2551_v58, %v1487_v37 }
 0x281   : > { %v2553_v2 = vpop.eup %2552 }
 0x282   : > { %v1492_v62 = vsel %vm1491_vm11, %v2551_v58, %v1488_v9  ;;  %v1454_v7 = vmul.f32 %v2553_v2, %v1338_v24  ;;  %vm1460_vm15 = vweird.f32 %v2553_v2 }
 0x283   : > { %v1517_v55 = vmul.f32 %v1492_v62, %v3669_v49  ;;  %v1452_v49 = vsel %vm1451_vm14, %v3844_v5, %v1448_v42  ;;  %vm1461_vm1 = vmor %vm1459_vm0, %vm1460_vm15 }
 0x284   : > { %v1455_v34 = vmul.f32 %v2553_v2, %v1454_v7  ;;  %v1513_v35 = vmul.f32 %v1452_v49, %v3639_v4 }
 0x285   : > { %v1537_v53 = vmul.f32 %v3651_v29, %v1517_v55 }
 0x286   : > { %v1456_v33 = vmul.f32 0.5, %v1455_v34  ;;  %v1533_v20 = vmul.f32 %v3651_v29, %v1513_v35  ;;  %v1609_v13 = vpop.f32.mrf.mxu1  ;;  %v1729_v35 = vlaneseq }
 0x287   : > { %v1557_v48 = vadd.f32 %v3659_v28, %v1537_v53  ;;  %v3888_v39 = vadd.f32 %v3817_v26, %v1609_v13 }
 0x288   : > { %v1457_v43 = vsub.f32 1.5, %v1456_v33  ;;  %v1553_v50 = vadd.f32 %v3659_v28, %v1533_v20  ;;  %v3954_v20 = vand.u32 127, %v1729_v35 }
 0x289   : > { %v1590_v63 = vpack.c.bf16 %v1558_v14, %v1557_v48  ;;  %v1926_v4 = vmul.f32 %v3888_v39, %v3888_v39  ;;  %v3939_v14 = vld [vmem:[%s4345_s8] ss:$0 sm:$0xff] }
 0x28a   : > { %v1458_v52 = vmul.f32 %v2553_v2, %v1457_v43  ;;  %vm1731_vm8 = vcmp.lt.s32.totalorder %v3954_v20, 4 }
 0x28b   : > { %1638 = vmatmul.bf16.gmra.mxu3 %v1590_v63  ;;  %1944 = vadd.xlane.f32.xlu1 %v1926_v4 }
 0x28c   : > { %v1462_v54 = vsel %vm1461_vm1, %v2553_v2, %v1458_v52 }
 0x28d   : > { %v1514_v60 = vmul.f32 %v1462_v54, %v3676_v41 }
 0x28e   : > { %v1611_v5 = vpop.f32.mrf.mxu1 }
 0x28f   : > { %v1534_v27 = vmul.f32 %v3651_v29, %v1514_v60  ;;  %v3895_v41 = vadd.f32 %v3817_v26, %v1611_v5 }
 0x291   : > { %v1554_v36 = vadd.f32 %v3659_v28, %v1534_v27  ;;  %v1927_v29 = vmul.f32 %v3895_v41, %v3895_v41  ;;  %v1669_v10 = vpack.c.bf16 %v3895_v41, %v3888_v39 }
 0x293   : > { %v1588_v32 = vpack.c.bf16 %v1554_v36, %v1553_v50  ;;  %1946 = vadd.xlane.f32.xlu2 %v1927_v29  ;;  %1693 = vmatmul.bf16.gmra.mxu2 %v1669_v10 }
 0x295   : > { %1628 = vmatmul.bf16.gmra.mxu1 %v1588_v32 }
 0x29c   : > { %v1614_v46 = vpop.f32.mrf.mxu1 }
 0x29d   : > { %v3902_v28 = vadd.f32 %v3817_v26, %v1614_v46 }
 0x29f   : > { %v1928_v61 = vmul.f32 %v3902_v28, %v3902_v28 }
 0x2a1   : > { %1948 = vadd.xlane.f32.xlu0 %v1928_v61 }
 0x2a4   : > { %v1616_v12 = vpop.f32.mrf.mxu1 }
 0x2a5   : > { %v3907_v57 = vadd.f32 %v3817_v26, %v1616_v12 }
 0x2a7   : > { %v1670_v44 = vpack.c.bf16 %v3907_v57, %v3902_v28  ;;  %v1929_v31 = vmul.f32 %v3907_v57, %v3907_v57 }
 0x2a9   : > { %1698 = vmatmul.bf16.gmra.mxu2 %v1670_v44  ;;  %1950 = vadd.xlane.f32.xlu1 %v1929_v31 }
 0x2e8   : > { %v1941_v30 = vpop.xlane.xlu2 %1940 }
 0x2e9   : > { %v1619_v51 = vpop.f32.mrf.mxu1  ;;  %v1972_v18 = vadd.f32 1e-12, %v1941_v30 }
 0x2ea   : > { %v3914_v11 = vadd.f32 %v3817_v26, %v1619_v51 }
 0x2eb   : > { %2554 = vrsqrt.f32 %v1972_v18  ;;  %vm1994_vm3 = vweird.f32 %v1972_v18 }
 0x2ec   : > { %v1930_v40 = vmul.f32 %v3914_v11, %v3914_v11 }
 0x2ee   : > { %1952 = vadd.xlane.f32.xlu2 %v1930_v40 }
 0x2f1   : > { %v1621_v58 = vpop.f32.mrf.mxu1  ;;  %v1943_v45 = vpop.xlane.xlu0 %1942 }
 0x2f2   : > { %v3919_v21 = vadd.f32 %v3817_v26, %v1621_v58  ;;  %v2555_v59 = vpop.eup %2554  ;;  %v1973_v47 = vadd.f32 1e-12, %v1943_v45 }
 0x2f3   : > { %v1989_v22 = vmul.f32 %v2555_v59, %v1972_v18  ;;  %vm1995_vm2 = vweird.f32 %v2555_v59 }
 0x2f4   : > { %v1931_v15 = vmul.f32 %v3919_v21, %v3919_v21  ;;  %v1671_v16 = vpack.c.bf16 %v3919_v21, %v3914_v11  ;;  %2556 = vrsqrt.f32 %v1973_v47  ;;  %vm1996_vm5 = vmor %vm1994_vm3, %vm1995_vm2  ;;  %vm2004_vm6 = vweird.f32 %v1973_v47 }
 0x2f5   : > { %v1990_v3 = vmul.f32 %v2555_v59, %v1989_v22 }
 0x2f6   : > { %1954 = vadd.xlane.f32.xlu0 %v1931_v15  ;;  %1703 = vmatmul.bf16.gmra.mxu2 %v1671_v16 }
 0x2f7   : > { %v1991_v24 = vmul.f32 0.5, %v1990_v3 }
 0x2f8   : > { %v1634_v62 = vpop.f32.mrf.mxu3 }
 0x2f9   : > { %v1992_v1 = vsub.f32 1.5, %v1991_v24  ;;  %v3945_v52 = vadd.f32 %v3817_v26, %v1634_v62 }
 0x2fa   : > { %v2557_v23 = vpop.eup %2556  ;;  %v1624_v6 = vpop.f32.mrf.mxu1 }
 0x2fb   : > { %v1999_v17 = vmul.f32 %v2557_v23, %v1973_v47  ;;  %v1993_v8 = vmul.f32 %v2555_v59, %v1992_v1  ;;  %vm2005_vm4 = vweird.f32 %v2557_v23  ;;  %v3929_v56 = vadd.f32 %v3817_v26, %v1624_v6 }
 0x2fc   : > { %vm2006_vm7 = vmor %vm2004_vm6, %vm2005_vm4 }
 0x2fd   : > { %v2000_v25 = vmul.f32 %v2557_v23, %v1999_v17  ;;  %v1997_v2 = vsel %vm1996_vm5, %v2555_v59, %v1993_v8  ;;  %v1932_v19 = vmul.f32 %v3929_v56, %v3929_v56 }
 0x2fe   : > { %v2148_v53 = vmul.f32 %v1997_v2, %v3847_v0  ;;  %v1945_v33 = vpop.xlane.xlu1 %1944 }
 0x2ff   : > { %v2001_v37 = vmul.f32 0.5, %v2000_v25  ;;  %1956 = vadd.xlane.f32.xlu1 %v1932_v19  ;;  %v1974_v49 = vadd.f32 1e-12, %v1945_v33 }
 0x300   : > { %v1689_v42 = vpop.f32.mrf.mxu2  ;;  %v1636_v63 = vpop.f32.mrf.mxu3 }
 0x301   : > { %v2002_v9 = vsub.f32 1.5, %v2001_v37  ;;  %v1690_v0 = vadd.f32 %v3939_v14, %v1689_v42  ;;  %2558 = vrsqrt.f32 %v1974_v49  ;;  %vm2014_vm10 = vweird.f32 %v1974_v49 }
 0x302   : > { %v1626_v43 = vpop.f32.mrf.mxu1 }
 0x303   : > { %v2003_v55 = vmul.f32 %v2557_v23, %v2002_v9  ;;  %v3952_v54 = vadd.f32 %v3817_v26, %v1626_v43  ;;  %v3964_v36 = vsel %vm1731_vm8, %v1690_v0, -1e+30 }
 0x304   : > { %1748 = vmax.xlane.f32.xlu2 %v3964_v36 }
 0x305   : > { %v2007_v7 = vsel %vm2006_vm7, %v2557_v23, %v2003_v55  ;;  %v1672_v50 = vpack.c.bf16 %v3952_v54, %v3929_v56 }
 0x306   : > { %v2149_v34 = vmul.f32 %v2007_v7, %v3865_v38  ;;  %v3949_v38 = vadd.f32 %v3817_v26, %v1636_v63  ;;  %v1947_v32 = vpop.xlane.xlu2 %1946 }
 0x307   : > { %1708 = vmatmul.bf16.gmra.mxu2 %v1672_v50  ;;  %v2559_v5 = vpop.eup %2558  ;;  %v1975_v29 = vadd.f32 1e-12, %v1947_v32 }
 0x308   : > { %v2374_v48 = vpack.c.bf16 %v2149_v34, %v2148_v53  ;;  %v1691_v60 = vpop.f32.mrf.mxu2  ;;  %v1674_v13 = vpack.c.bf16 %v3949_v38, %v3945_v52  ;;  %v2009_v46 = vmul.f32 %v2559_v5, %v1974_v49  ;;  %vm2015_vm9 = vweird.f32 %v2559_v5 }
 0x309   : > { %v1692_v27 = vadd.f32 %v3939_v14, %v1691_v60  ;;  %2560 = vrsqrt.f32 %v1975_v29  ;;  %vm2016_vm12 = vmor %vm2014_vm10, %vm2015_vm9  ;;  %vm2024_vm13 = vweird.f32 %v1975_v29  ;;  %v1937_v20 = vmul.f32 %v3949_v38, %v3949_v38 }
 0x30a   : > { %2375 = vst [vmem:[%s3941_s26] sm:$0xff] %v2374_v48   ;;  %1718 = vmatmul.bf16.vlgmr.msrb.gmra.mxu3 %v1674_v13  ;;  %v2010_v12 = vmul.f32 %v2559_v5, %v2009_v46 }
 0x30b   : > { %v3968_v4 = vsel %vm1731_vm8, %v1692_v27, -1e+30 }
 0x30c   : > { %1750 = vmax.xlane.f32.xlu0 %v3968_v4  ;;  %v2011_v44 = vmul.f32 0.5, %v2010_v12 }
 0x30e   : > { %v1639_v10 = vpop.f32.mrf.mxu3  ;;  %v2012_v40 = vsub.f32 1.5, %v2011_v44 }
 0x30f   : > { %v2561_v51 = vpop.eup %2560  ;;  %v3973_v45 = vadd.f32 %v3817_v26, %v1639_v10 }
 0x310   : > { %v2019_v58 = vmul.f32 %v2561_v51, %v1975_v29  ;;  %v2013_v23 = vmul.f32 %v2559_v5, %v2012_v40  ;;  %vm2025_vm11 = vweird.f32 %v2561_v51 }
 0x311   : > { %vm2026_vm14 = vmor %vm2024_vm13, %vm2025_vm11 }
 0x312   : > { %v1629_v61 = vpop.f32.mrf.mxu1  ;;  %v2020_v22 = vmul.f32 %v2561_v51, %v2019_v58  ;;  %v2017_v9 = vsel %vm2016_vm12, %v2559_v5, %v2013_v23 }
 0x313   : > { %v3979_v15 = vadd.f32 %v3817_v26, %v1629_v61  ;;  %v2150_v7 = vmul.f32 %v2017_v9, %v3888_v39 }
 0x314   : > { %v1949_v31 = vpop.xlane.xlu0 %1948  ;;  %v2021_v1 = vmul.f32 0.5, %v2020_v22 }
 0x315   : > { %v1976_v30 = vadd.f32 1e-12, %v1949_v31 }
 0x316   : > { %v1641_v18 = vpop.f32.mrf.mxu3  ;;  %v2022_v17 = vsub.f32 1.5, %v2021_v1  ;;  %v1694_v25 = vpop.f32.mrf.mxu2 }
 0x317   : > { %v3976_v59 = vadd.f32 %v3817_v26, %v1641_v18  ;;  %2562 = vrsqrt.f32 %v1976_v30  ;;  %vm2034_vm0 = vweird.f32 %v1976_v30 }
 0x318   : > { %v2023_v62 = vmul.f32 %v2561_v51, %v2022_v17 }
 0x319   : > { %v1675_v3 = vpack.c.bf16 %v3976_v59, %v3973_v45 }
 0x31a   : > { %v1631_v47 = vpop.f32.mrf.mxu1  ;;  %v2027_v19 = vsel %vm2026_vm14, %v2561_v51, %v2023_v62 }
 0x31b   : > { %v3982_v16 = vadd.f32 %v3817_v26, %v1631_v47  ;;  %1723 = vmatmul.bf16.gmra.mxu3 %v1675_v3  ;;  %v1695_v26 = vadd.f32 %v3939_v14, %v1694_v25  ;;  %v2151_v53 = vmul.f32 %v2027_v19, %v3895_v41 }
 0x31c   : > { %v1951_v8 = vpop.xlane.xlu1 %1950 }
 0x31d   : > { %v1673_v24 = vpack.c.bf16 %v3982_v16, %v3979_v15  ;;  %v2563_v37 = vpop.eup %2562  ;;  %v1977_v6 = vadd.f32 1e-12, %v1951_v8  ;;  %v3991_v55 = vsel %vm1731_vm8, %v1695_v26, -1e+30  ;;  %v2379_v48 = vpack.c.bf16 %v2151_v53, %v2150_v7 }
 0x31e   : > { %v2029_v2 = vmul.f32 %v2563_v37, %v1976_v30  ;;  %1752 = vmax.xlane.f32.xlu1 %v3991_v55  ;;  %v1696_v33 = vpop.f32.mrf.mxu2  ;;  %vm2035_vm15 = vweird.f32 %v2563_v37 }
 0x31f   : > { %1713 = vmatmul.bf16.gmra.mxu2 %v1673_v24  ;;  %2564 = vrsqrt.f32 %v1977_v6  ;;  %2411 = vst [vmem:[%s3941_s26 + $0x8] sm:$0xff] %v2379_v48   ;;  %v1697_v63 = vadd.f32 %v3939_v14, %v1696_v33  ;;  %vm2036_vm2 = vmor %vm2034_vm0, %vm2035_vm15  ;;  %vm2044_vm3 = vweird.f32 %v1977_v6 }
 0x320   : > { %v2030_v42 = vmul.f32 %v2563_v37, %v2029_v2 }
 0x321   : > { %v4000_v0 = vsel %vm1731_vm8, %v1697_v63, -1e+30 }
 0x322   : > { %v2031_v34 = vmul.f32 0.5, %v2030_v42  ;;  %1754 = vmax.xlane.f32.xlu2 %v4000_v0 }
 0x324   : > { %v2032_v43 = vsub.f32 1.5, %v2031_v34 }
 0x325   : > { %v2565_v49 = vpop.eup %2564 }
 0x326   : > { %v2039_v35 = vmul.f32 %v2565_v49, %v1977_v6  ;;  %v2033_v27 = vmul.f32 %v2563_v37, %v2032_v43  ;;  %vm2045_vm1 = vweird.f32 %v2565_v49 }
 0x327   : > { %vm2046_vm4 = vmor %vm2044_vm3, %vm2045_vm1 }
 0x328   : > { %v2040_v60 = vmul.f32 %v2565_v49, %v2039_v35  ;;  %v2037_v32 = vsel %vm2036_vm2, %v2563_v37, %v2033_v27 }
 0x329   : > { %v2152_v46 = vmul.f32 %v2037_v32, %v3902_v28 }
 0x32a   : > { %v2041_v39 = vmul.f32 0.5, %v2040_v60 }
 0x32c   : > { %v2042_v41 = vsub.f32 1.5, %v2041_v39  ;;  %v1699_v13 = vpop.f32.mrf.mxu2 }
 0x32d   : > { %v1700_v50 = vadd.f32 %v3939_v14, %v1699_v13 }
 0x32e   : > { %v2043_v5 = vmul.f32 %v2565_v49, %v2042_v41 }
 0x32f   : > { %v4006_v29 = vsel %vm1731_vm8, %v1700_v50, -1e+30 }
 0x330   : > { %v2047_v10 = vsel %vm2046_vm4, %v2565_v49, %v2043_v5  ;;  %1756 = vmax.xlane.f32.xlu0 %v4006_v29 }
 0x331   : > { %v2153_v61 = vmul.f32 %v2047_v10, %v3907_v57 }
 0x333   : > { %v2384_v12 = vpack.c.bf16 %v2153_v61, %v2152_v46 }
 0x334   : > { %v1701_v44 = vpop.f32.mrf.mxu2 }
 0x335   : > { %2412 = vst [vmem:[%s3941_s26 + $0x10] sm:$0xff] %v2384_v12   ;;  %v1702_v31 = vadd.f32 %v3939_v14, %v1701_v44 }
 0x337   : > { %v4015_v51 = vsel %vm1731_vm8, %v1702_v31, -1e+30 }
 0x338   : > { %1758 = vmax.xlane.f32.xlu1 %v4015_v51 }
 0x361   : > { %v1953_v30 = vpop.xlane.xlu2 %1952 }
 0x362   : > { %v1978_v18 = vadd.f32 1e-12, %v1953_v30 }
 0x364   : > { %2566 = vrsqrt.f32 %v1978_v18  ;;  %vm2054_vm6 = vweird.f32 %v1978_v18 }
 0x369   : > { %v1955_v40 = vpop.xlane.xlu0 %1954 }
 0x36a   : > { %v2567_v58 = vpop.eup %2566  ;;  %v1979_v47 = vadd.f32 1e-12, %v1955_v40 }
 0x36b   : > { %v2049_v28 = vmul.f32 %v2567_v58, %v1978_v18  ;;  %vm2055_vm5 = vweird.f32 %v2567_v58 }
 0x36c   : > { %2568 = vrsqrt.f32 %v1979_v47  ;;  %vm2056_vm9 = vmor %vm2054_vm6, %vm2055_vm5  ;;  %vm2064_vm10 = vweird.f32 %v1979_v47 }
 0x36d   : > { %v2050_v57 = vmul.f32 %v2567_v58, %v2049_v28  ;;  %v1934_v28 = vmul.f32 %v3979_v15, %v3979_v15 }
 0x36f   : > { %v2051_v22 = vmul.f32 0.5, %v2050_v57 }
 0x371   : > { %v2052_v24 = vsub.f32 1.5, %v2051_v22 }
 0x372   : > { %v2569_v3 = vpop.eup %2568  ;;  %v4076_v40 = vpop.xlane.xlu1 %1956 }
 0x373   : > { %v2059_v23 = vmul.f32 %v2569_v3, %v1979_v47  ;;  %v2053_v17 = vmul.f32 %v2567_v58, %v2052_v24  ;;  %vm2065_vm7 = vweird.f32 %v2569_v3 }
 0x374   : > { %vm2066_vm11 = vmor %vm2064_vm10, %vm2065_vm7 }
 0x375   : > { %v2060_v1 = vmul.f32 %v2569_v3, %v2059_v23  ;;  %v2057_v6 = vsel %vm2056_vm9, %v2567_v58, %v2053_v17  ;;  %v1933_v58 = vmul.f32 %v3952_v54, %v3952_v54  ;;  %v1936_v23 = vmul.f32 %v3945_v52, %v3945_v52 }
 0x376   : > { %v2154_v19 = vmul.f32 %v2057_v6, %v3914_v11  ;;  %v1935_v17 = vmul.f32 %v3982_v16, %v3982_v16 }
 0x377   : > { %v2061_v25 = vmul.f32 0.5, %v2060_v1  ;;  %v1749_v47 = vpop.xlane.xlu2 %1748 }
 0x378   : > { %v4088_v22 = vsub.f32 %v3964_v36, %v1749_v47 }
 0x379   : > { %v2062_v8 = vsub.f32 1.5, %v2061_v25  ;;  %v1704_v37 = vpop.f32.mrf.mxu2 }
 0x37a   : > { %v1705_v26 = vadd.f32 %v3939_v14, %v1704_v37 }
 0x37b   : > { %v2063_v9 = vmul.f32 %v2569_v3, %v2062_v8 }
 0x37c   : > { %v4021_v62 = vsel %vm1731_vm8, %v1705_v26, -1e+30 }
 0x37d   : > { %v2067_v2 = vsel %vm2066_vm11, %v2569_v3, %v2063_v9  ;;  %1760 = vmax.xlane.f32.xlu2 %v4021_v62  ;;  %v1796_v3 = vmul.f32 1.442695, %v4088_v22 }
 0x37e   : > { %v2155_v42 = vmul.f32 %v2067_v2, %v3919_v21 }
 0x37f   : > { %2570 = vpow2.f32 %v1796_v3 }
 0x380   : > { %v2389_v7 = vpack.c.bf16 %v2155_v42, %v2154_v19 }
 0x381   : > { %v1706_v53 = vpop.f32.mrf.mxu2 }
 0x382   : > { %2413 = vst [vmem:[%s3941_s26 + $0x18] sm:$0xff] %v2389_v7   ;;  %v1707_v34 = vadd.f32 %v3939_v14, %v1706_v53 }
 0x384   : > { %v4030_v48 = vsel %vm1731_vm8, %v1707_v34, -1e+30 }
 0x385   : > { %1762 = vmax.xlane.f32.xlu0 %v4030_v48  ;;  %v2571_v19 = vpop.eup %2570 }
 0x38a   : > { %v1709_v49 = vpop.f32.mrf.mxu2 }
 0x38b   : > { %v1710_v63 = vadd.f32 %v3939_v14, %v1709_v49 }
 0x38d   : > { %v1719_v33 = vpop.f32.mrf.mxu3  ;;  %v4036_v11 = vsel %vm1731_vm8, %v1710_v63, -1e+30 }
 0x38e   : > { %1764 = vmax.xlane.f32.xlu1 %v4036_v11  ;;  %v1720_v27 = vadd.f32 %v3939_v14, %v1719_v33 }
 0x390   : > { %v4049_v50 = vsel %vm1731_vm8, %v1720_v27, -1e+30 }
 0x391   : > { %v1753_v24 = vpop.xlane.xlu1 %1752 }
 0x392   : > { %v1711_v43 = vpop.f32.mrf.mxu2  ;;  %v4101_v36 = vsub.f32 %v3991_v55, %v1753_v24  ;;  %v1938_v55 = vmul.f32 %v3973_v45, %v3973_v45 }
 0x393   : > { %v1712_v35 = vadd.f32 %v3939_v14, %v1711_v43 }
 0x394   : > { %v1800_v26 = vmul.f32 1.442695, %v4101_v36 }
 0x395   : > { %v1721_v21 = vpop.f32.mrf.mxu3  ;;  %v4042_v60 = vsel %vm1731_vm8, %v1712_v35, -1e+30  ;;  %v1755_v1 = vpop.xlane.xlu2 %1754 }
 0x396   : > { %1766 = vmax.xlane.f32.xlu2 %v4042_v60  ;;  %v1722_v5 = vadd.f32 %v3939_v14, %v1721_v21  ;;  %v4104_v8 = vsub.f32 %v4000_v0, %v1755_v1 }
 0x398   : > { %v4071_v30 = vsel %vm1731_vm8, %v1722_v5, -1e+30  ;;  %v1802_v6 = vmul.f32 1.442695, %v4104_v8 }
 0x39e   : > { %v1724_v39 = vpop.f32.mrf.mxu3  ;;  %1772 = vmax.xlane.f32.xlu2 %v4049_v50 }
 0x39f   : > { %v1725_v18 = vadd.f32 %v3939_v14, %v1724_v39 }
 0x3a1   : > { %v4084_v57 = vsel %vm1731_vm8, %v1725_v18, -1e+30  ;;  %v4138_v18 = vadd.f32 1e-12, %v4076_v40 }
 0x3a2   : > { %v1714_v41 = vpop.f32.mrf.mxu2 }
 0x3a3   : > { %v1715_v13 = vadd.f32 %v3939_v14, %v1714_v41  ;;  %vm2074_vm12 = vweird.f32 %v4138_v18 }
 0x3a5   : > { %v4054_v32 = vsel %vm1731_vm8, %v1715_v13, -1e+30 }
 0x3a6   : > { %1768 = vmax.xlane.f32.xlu0 %v4054_v32  ;;  %v1726_v10 = vpop.f32.mrf.mxu3 }
 0x3a7   : > { %v1727_v46 = vadd.f32 %v3939_v14, %v1726_v10 }
 0x3a9   : > { %v4062_v44 = vsel %vm1731_vm8, %v1727_v46, -1e+30 }
 0x3aa   : > { %v1716_v61 = vpop.f32.mrf.mxu2  ;;  %1778 = vmax.xlane.f32.xlu2 %v4062_v44 }
 0x3ab   : > { %v1717_v12 = vadd.f32 %v3939_v14, %v1716_v61  ;;  %v1751_v14 = vpop.xlane.xlu0 %1750  ;;  %v1759_v9 = vpop.xlane.xlu1 %1758 }
 0x3ac   : > { %v4098_v25 = vsub.f32 %v3968_v4, %v1751_v14  ;;  %v1939_v4 = vmul.f32 %v3976_v59, %v3976_v59  ;;  %v4114_v0 = vsub.f32 %v4015_v51, %v1759_v9 }
 0x3ad   : > { %v4067_v31 = vsel %vm1731_vm8, %v1717_v12, -1e+30 }
 0x3ae   : > { %1770 = vmax.xlane.f32.xlu1 %v4067_v31  ;;  %1774 = vmax.xlane.f32.xlu0 %v4071_v30  ;;  %v1798_v37 = vmul.f32 1.442695, %v4098_v25  ;;  %v1806_v7 = vmul.f32 1.442695, %v4114_v0 }
 0x3b0   : > { %2572 = vpow2.f32 %v1798_v37 }
 0x3b1   : > { %2574 = vpow2.f32 %v1800_v26 }
 0x3b2   : > { %1958 = vadd.xlane.f32.xlu2 %v1933_v58  ;;  %2576 = vpow2.f32 %v1802_v6 }
 0x3b3   : > { %v1757_v2 = vpop.xlane.xlu0 %1756  ;;  %2578 = vpow2.f32 %v1806_v7 }
 0x3b4   : > { %v4117_v42 = vsub.f32 %v4006_v29, %v1757_v2 }
 0x3b6   : > { %1776 = vmax.xlane.f32.xlu1 %v4084_v57  ;;  %1960 = vadd.xlane.f32.xlu0 %v1934_v28  ;;  %v2573_v53 = vpop.eup %2572  ;;  %v1804_v34 = vmul.f32 1.442695, %v4117_v42 }
 0x3b7   : > { %v2575_v33 = vpop.eup %2574 }
 0x3b8   : > { %v2577_v49 = vpop.eup %2576  ;;  %2580 = vpow2.f32 %v1804_v34 }
 0x3b9   : > { %v2579_v51 = vpop.eup %2578 }
 0x3ba   : > { %1964 = vadd.xlane.f32.xlu2 %v1936_v23 }
 0x3be   : > { %1962 = vadd.xlane.f32.xlu1 %v1935_v17  ;;  %1966 = vadd.xlane.f32.xlu0 %v1937_v20  ;;  %v2581_v63 = vpop.eup %2580 }
 0x3c2   : > { %1970 = vadd.xlane.f32.xlu2 %v1939_v4 }
 0x3c6   : > { %1968 = vadd.xlane.f32.xlu1 %v1938_v55  ;;  %1828 = vadd.xlane.f32.xlu0 %v2571_v19 }
 0x3ca   : > { %1832 = vadd.xlane.f32.xlu2 %v2575_v33 }
 0x3ce   : > { %1834 = vadd.xlane.f32.xlu0 %v2577_v49  ;;  %1830 = vadd.xlane.f32.xlu1 %v2573_v53 }
 0x3d2   : > { %1838 = vadd.xlane.f32.xlu2 %v2579_v51 }
 0x3d6   : > { %1836 = vadd.xlane.f32.xlu1 %v2581_v63 }
 0x3f0   : > { %v1761_v21 = vpop.xlane.xlu2 %1760 }
 0x3f1   : > { %v4122_v29 = vsub.f32 %v4021_v62, %v1761_v21 }
 0x3f3   : > { %v1808_v43 = vmul.f32 1.442695, %v4122_v29 }
 0x3f5   : > { %2582 = vpow2.f32 %v1808_v43 }
 0x3f8   : > { %v1763_v35 = vpop.xlane.xlu0 %1762 }
 0x3f9   : > { %v4126_v27 = vsub.f32 %v4030_v48, %v1763_v35 }
 0x3fb   : > { %v2583_v39 = vpop.eup %2582  ;;  %v1810_v41 = vmul.f32 1.442695, %v4126_v27 }
 0x3fc   : > { %1840 = vadd.xlane.f32.xlu0 %v2583_v39 }
 0x3fd   : > { %2584 = vpow2.f32 %v1810_v41 }
 0x401   : > { %v1765_v5 = vpop.xlane.xlu1 %1764 }
 0x402   : > { %v4130_v10 = vsub.f32 %v4036_v11, %v1765_v5 }
 0x403   : > { %v2585_v13 = vpop.eup %2584 }
 0x404   : > { %1842 = vadd.xlane.f32.xlu1 %v2585_v13  ;;  %v1812_v62 = vmul.f32 1.442695, %v4130_v10 }
 0x406   : > { %2586 = vpow2.f32 %v1812_v62 }
 0x409   : > { %v1767_v46 = vpop.xlane.xlu2 %1766 }
 0x40a   : > { %v4134_v61 = vsub.f32 %v4042_v60, %v1767_v46 }
 0x40c   : > { %v2587_v48 = vpop.eup %2586  ;;  %v1814_v12 = vmul.f32 1.442695, %v4134_v61 }
 0x40d   : > { %1844 = vadd.xlane.f32.xlu2 %v2587_v48 }
 0x40e   : > { %2588 = vpow2.f32 %v1814_v12 }
 0x40f   : > { %2590 = vrsqrt.f32 %v4138_v18 }
 0x411   : > { %v1773_v58 = vpop.xlane.xlu2 %1772 }
 0x412   : > { %v4146_v60 = vsub.f32 %v4049_v50, %v1773_v58 }
 0x414   : > { %v2589_v28 = vpop.eup %2588  ;;  %v1820_v24 = vmul.f32 1.442695, %v4146_v60 }
 0x415   : > { %1846 = vadd.xlane.f32.xlu0 %v2589_v28  ;;  %v4149_v1 = vpop.eup %2590 }
 0x416   : > { %v2069_v26 = vmul.f32 %v4149_v1, %v4138_v18  ;;  %vm2075_vm8 = vweird.f32 %v4149_v1 }
 0x417   : > { %vm4190_vm13 = vmor %vm2074_vm12, %vm2075_vm8 }
 0x418   : > { %v2070_v9 = vmul.f32 %v4149_v1, %v2069_v26 }
 0x419   : > { %v1769_v47 = vpop.xlane.xlu0 %1768 }
 0x41a   : > { %v4141_v11 = vsub.f32 %v4054_v32, %v1769_v47  ;;  %v2071_v49 = vmul.f32 0.5, %v2070_v9 }
 0x41c   : > { %v1816_v14 = vmul.f32 1.442695, %v4141_v11 }
 0x41d   : > { %v1779_v3 = vpop.xlane.xlu2 %1778 }
 0x41e   : > { %2592 = vpow2.f32 %v1816_v14  ;;  %v4162_v6 = vsub.f32 %v4062_v44, %v1779_v3 }
 0x41f   : > { %2594 = vpow2.f32 %v1820_v24 }
 0x421   : > { %v1771_v40 = vpop.xlane.xlu1 %1770  ;;  %v1775_v23 = vpop.xlane.xlu0 %1774 }
 0x422   : > { %v4152_v32 = vsub.f32 %v4067_v31, %v1771_v40  ;;  %v4155_v17 = vsub.f32 %v4071_v30, %v1775_v23  ;;  %v1826_v30 = vmul.f32 1.442695, %v4162_v6 }
 0x424   : > { %v2593_v20 = vpop.eup %2592  ;;  %v1818_v37 = vmul.f32 1.442695, %v4152_v32  ;;  %v1822_v50 = vmul.f32 1.442695, %v4155_v17 }
 0x425   : > { %1848 = vadd.xlane.f32.xlu1 %v2593_v20  ;;  %v1959_v31 = vpop.xlane.xlu2 %1958  ;;  %v2595_v53 = vpop.eup %2594 }
 0x426   : > { %2596 = vpow2.f32 %v1818_v37  ;;  %v1981_v4 = vadd.f32 1e-12, %v1959_v31 }
 0x427   : > { %2598 = vpow2.f32 %v1822_v50 }
 0x428   : > { %2600 = vrsqrt.f32 %v1981_v4  ;;  %vm2084_vm15 = vweird.f32 %v1981_v4 }
 0x429   : > { %v1777_v2 = vpop.xlane.xlu1 %1776  ;;  %v1961_v55 = vpop.xlane.xlu0 %1960 }
 0x42a   : > { %v4167_v19 = vsub.f32 %v4084_v57, %v1777_v2  ;;  %v4169_v7 = vadd.f32 1e-12, %v1961_v55  ;;  %v2072_v57 = vsub.f32 1.5, %v2071_v49 }
 0x42c   : > { %v2597_v44 = vpop.eup %2596  ;;  %v1824_v34 = vmul.f32 1.442695, %v4167_v19  ;;  %2602 = vrsqrt.f32 %v4169_v7  ;;  %v2073_v58 = vmul.f32 %v4149_v1, %v2072_v57  ;;  %vm2094_vm2 = vweird.f32 %v4169_v7 }
 0x42d   : > { %v2599_v33 = vpop.eup %2598  ;;  %2604 = vpow2.f32 %v1826_v30  ;;  %1850 = vadd.xlane.f32.xlu0 %v2597_v44  ;;  %1852 = vadd.xlane.f32.xlu1 %v2595_v53  ;;  %v1965_v51 = vpop.xlane.xlu2 %1964 }
 0x42e   : > { %2606 = vpow2.f32 %v1824_v34  ;;  %1854 = vadd.xlane.f32.xlu2 %v2599_v33  ;;  %v2601_v63 = vpop.eup %2600  ;;  %v4173_v21 = vadd.f32 1e-12, %v1965_v51  ;;  %v2077_v20 = vsel %vm4190_vm13, %v4149_v1, %v2073_v58 }
 0x42f   : > { %v2079_v41 = vmul.f32 %v2601_v63, %v1981_v4  ;;  %vm2085_vm14 = vweird.f32 %v2601_v63  ;;  %v2156_v34 = vmul.f32 %v2077_v20, %v3929_v56 }
 0x430   : > { %2608 = vrsqrt.f32 %v4173_v21  ;;  %vm2086_vm0 = vmor %vm2084_vm15, %vm2085_vm14  ;;  %vm2114_vm3 = vweird.f32 %v4173_v21 }
 0x431   : > { %v1963_v43 = vpop.xlane.xlu1 %1962  ;;  %v1967_v35 = vpop.xlane.xlu0 %1966  ;;  %v2080_v12 = vmul.f32 %v2601_v63, %v2079_v41 }
 0x432   : > { %v4175_v39 = vpop.eup %2602  ;;  %v4177_v13 = vadd.f32 1e-12, %v1963_v43  ;;  %v4179_v5 = vadd.f32 1e-12, %v1967_v35 }
 0x433   : > { %v2605_v62 = vpop.eup %2604  ;;  %v2089_v46 = vmul.f32 %v4175_v39, %v4169_v7  ;;  %v2081_v28 = vmul.f32 0.5, %v2080_v12  ;;  %vm2095_vm1 = vweird.f32 %v4175_v39 }
 0x434   : > { %v2607_v48 = vpop.eup %2606  ;;  %2610 = vrsqrt.f32 %v4177_v13  ;;  %vm4217_vm5 = vmor %vm2094_vm2, %vm2095_vm1  ;;  %vm2104_vm10 = vweird.f32 %v4177_v13  ;;  %vm2124_vm11 = vweird.f32 %v4179_v5 }
 0x435   : > { %v2090_v47 = vmul.f32 %v4175_v39, %v2089_v46  ;;  %2612 = vrsqrt.f32 %v4179_v5  ;;  %1856 = vadd.xlane.f32.xlu0 %v2607_v48  ;;  %1858 = vadd.xlane.f32.xlu1 %v2605_v62  ;;  %v2082_v24 = vsub.f32 1.5, %v2081_v28  ;;  %v1971_v40 = vpop.xlane.xlu2 %1970 }
 0x436   : > { %v2609_v23 = vpop.eup %2608  ;;  %v4197_v37 = vadd.f32 1e-12, %v1971_v40 }
 0x437   : > { %v2091_v14 = vmul.f32 0.5, %v2090_v47  ;;  %v2083_v18 = vmul.f32 %v2601_v63, %v2082_v24  ;;  %v2109_v30 = vmul.f32 %v2609_v23, %v4173_v21  ;;  %vm2115_vm4 = vweird.f32 %v2609_v23 }
 0x438   : > { %2614 = vrsqrt.f32 %v4197_v37  ;;  %vm2116_vm9 = vmor %vm2114_vm3, %vm2115_vm4  ;;  %vm2144_vm14 = vweird.f32 %v4197_v37 }
 0x439   : > { %v1969_v50 = vpop.xlane.xlu1 %1968  ;;  %v1829_v26 = vpop.xlane.xlu0 %1828  ;;  %v2092_v9 = vsub.f32 1.5, %v2091_v14  ;;  %v2087_v44 = vsel %vm2086_vm0, %v2601_v63, %v2083_v18  ;;  %v2110_v1 = vmul.f32 %v2609_v23, %v2109_v30 }
 0x43a   : > { %v2611_v31 = vpop.eup %2610  ;;  %v4200_v2 = vadd.f32 1e-12, %v1969_v50  ;;  %v2157_v33 = vmul.f32 %v2087_v44, %v3952_v54 }
 0x43b   : > { %v2613_v55 = vpop.eup %2612  ;;  %v2099_v53 = vmul.f32 %v2611_v31, %v4177_v13  ;;  %v2093_v51 = vmul.f32 %v4175_v39, %v2092_v9  ;;  %v2111_v57 = vmul.f32 0.5, %v2110_v1  ;;  %vm2105_vm6 = vweird.f32 %v2611_v31 }
 0x43c   : > { %v2119_v4 = vmul.f32 %v2613_v55, %v4179_v5  ;;  %2616 = vrsqrt.f32 %v4200_v2  ;;  %v2394_v35 = vpack.c.bf16 %v2157_v33, %v2156_v34  ;;  %vm2125_vm7 = vweird.f32 %v2613_v55  ;;  %vm2106_vm8 = vmor %vm2104_vm10, %vm2105_vm6 }
 0x43d   : > { %v2100_v49 = vmul.f32 %v2611_v31, %v2099_v53  ;;  %2618 = vlog2.f32 %v1829_v26  ;;  %v2112_v41 = vsub.f32 1.5, %v2111_v57  ;;  %v1833_v54 = vpop.xlane.xlu2 %1832  ;;  %v2097_v58 = vsel %vm4217_vm5, %v4175_v39, %v2093_v51  ;;  %vm2126_vm12 = vmor %vm2124_vm11, %vm2125_vm7 }
 0x43e   : > { %v2120_v43 = vmul.f32 %v2613_v55, %v2119_v4  ;;  %v4212_v62 = vpop.eup %2614  ;;  %2414 = vst [vmem:[%s3941_s26 + $0x20] sm:$0xff] %v2394_v35   ;;  %2620 = vlog2.f32 %v1833_v54  ;;  %v2158_v26 = vmul.f32 %v2097_v58, %v3979_v15  ;;  %vm2134_vm1 = vweird.f32 %v4200_v2 }
 0x43f   : > { %v2101_v63 = vmul.f32 0.5, %v2100_v49  ;;  %v2113_v47 = vmul.f32 %v2609_v23, %v2112_v41  ;;  %v2139_v14 = vmul.f32 %v4212_v62, %v4197_v37  ;;  %vm2145_vm13 = vweird.f32 %v4212_v62 }
 0x440   : > { %v2121_v56 = vmul.f32 0.5, %v2120_v43  ;;  %vm2146_vm15 = vmor %vm2144_vm14, %vm2145_vm13 }
 0x441   : > { %v2102_v48 = vsub.f32 1.5, %v2101_v63  ;;  %v1831_v7 = vpop.xlane.xlu1 %1830  ;;  %v1835_v12 = vpop.xlane.xlu0 %1834  ;;  %v2117_v40 = vsel %vm2116_vm9, %v2609_v23, %v2113_v47  ;;  %v2140_v20 = vmul.f32 %v4212_v62, %v2139_v14 }
 0x442   : > { %v2122_v28 = vsub.f32 1.5, %v2121_v56  ;;  %2622 = vlog2.f32 %v1831_v7  ;;  %v2617_v24 = vpop.eup %2616  ;;  %v2160_v21 = vmul.f32 %v2117_v40, %v3945_v52 }
 0x443   : > { %v2103_v3 = vmul.f32 %v2611_v31, %v2102_v48  ;;  %2624 = vlog2.f32 %v1835_v12  ;;  %v2619_v50 = vpop.eup %2618  ;;  %v2129_v13 = vmul.f32 %v2617_v24, %v4200_v2  ;;  %v2141_v9 = vmul.f32 0.5, %v2140_v20 }
 0x444   : > { %v2123_v39 = vmul.f32 %v2613_v55, %v2122_v28  ;;  %v1861_v30 = vmul.f32 0.6931472, %v2619_v50  ;;  %v2621_v53 = vpop.eup %2620  ;;  %vm2135_vm0 = vweird.f32 %v2617_v24 }
 0x445   : > { %v2107_v18 = vsel %vm2106_vm8, %v2611_v31, %v2103_v3  ;;  %v2130_v15 = vmul.f32 %v2617_v24, %v2129_v13  ;;  %v2142_v52 = vsub.f32 1.5, %v2141_v9  ;;  %v1865_v4 = vmul.f32 0.6931472, %v2621_v53  ;;  %v1839_v34 = vpop.xlane.xlu2 %1838  ;;  %vm2136_vm2 = vmor %vm2134_vm1, %vm2135_vm0 }
 0x446   : > { %v2159_v5 = vmul.f32 %v2107_v18, %v3982_v16  ;;  %v2127_v23 = vsel %vm2126_vm12, %v2613_v55, %v2123_v39  ;;  %v1892_v31 = vsub.f32 %v4088_v22, %v1861_v30  ;;  %2626 = vlog2.f32 %v1839_v34 }
 0x447   : > { %v2161_v44 = vmul.f32 %v2127_v23, %v3949_v38  ;;  %v2131_v55 = vmul.f32 0.5, %v2130_v15  ;;  %v2143_v51 = vmul.f32 %v4212_v62, %v2142_v52  ;;  %v1894_v57 = vsub.f32 %v4101_v36, %v1865_v4 }
 0x448   : > { %v2399_v1 = vpack.c.bf16 %v2159_v5, %v2158_v26  ;;  %v2623_v33 = vpop.eup %2622  ;;  %1908 = vst [vmem:[%s4253_s29] sm:$0xff] %v1892_v31 }
 0x449   : > { %v2404_v16 = vpack.c.bf16 %v2161_v44, %v2160_v21  ;;  %v1837_v49 = vpop.xlane.xlu1 %1836  ;;  %v2625_v38 = vpop.eup %2624  ;;  %v1863_v43 = vmul.f32 0.6931472, %v2623_v33  ;;  %v2132_v22 = vsub.f32 1.5, %v2131_v55  ;;  %v2147_v35 = vsel %vm2146_vm15, %v4212_v62, %v2143_v51  ;;  %1910 = vst [vmem:[%s4253_s29 + $0x10] sm:$0xff] %v1894_v57 }
 0x44a   : > { %2415 = vst [vmem:[%s3941_s26 + $0x28] sm:$0xff] %v2399_v1   ;;  %2628 = vlog2.f32 %v1837_v49  ;;  %v1867_v37 = vmul.f32 0.6931472, %v2625_v38  ;;  %v2163_v56 = vmul.f32 %v2147_v35, %v3976_v59 }
 0x44b   : > { %2416 = vst [vmem:[%s3941_s26 + $0x30] sm:$0xff] %v2404_v16   ;;  %v1893_v36 = vsub.f32 %v4098_v25, %v1863_v43  ;;  %v2133_v63 = vmul.f32 %v2617_v24, %v2132_v22 }
 0x44c   : > { %v1895_v41 = vsub.f32 %v4104_v8, %v1867_v37  ;;  %v2627_v54 = vpop.eup %2626 }
 0x44d   : > { %1909 = vst [vmem:[%s4253_s29 + $0x8] sm:$0xff] %v1893_v36  ;;  %v2137_v62 = vsel %vm2136_vm2, %v2617_v24, %v2133_v63  ;;  %v1871_v46 = vmul.f32 0.6931472, %v2627_v54 }
 0x44e   : > { %1911 = vst [vmem:[%s4253_s29 + $0x18] sm:$0xff] %v1895_v41  ;;  %v2162_v2 = vmul.f32 %v2137_v62, %v3973_v45 }
 0x44f   : > { %v1897_v59 = vsub.f32 %v4114_v0, %v1871_v46 }
 0x450   : > { %v2629_v25 = vpop.eup %2628  ;;  %v2409_v48 = vpack.c.bf16 %v2163_v56, %v2162_v2 }
 0x451   : > { %v1869_v8 = vmul.f32 0.6931472, %v2629_v25  ;;  %1913 = vst [vmem:[%s4253_s29 + $0x28] sm:$0xff] %v1897_v59 }
 0x452   : > { %2417 = vst [vmem:[%s3941_s26 + $0x38] sm:$0xff] %v2409_v48  }
 0x453   : > { %v1896_v7 = vsub.f32 %v4117_v42, %v1869_v8 }
 0x455   : > { %1912 = vst [vmem:[%s4253_s29 + $0x20] sm:$0xff] %v1896_v7 }
 0x456   : > { %2677 = shalt.err (!%p2674_p3)
}
 0x457   : > { %s2747_s26 = smov 64   ;;  %s2748_s1 = smov 4  }
 0x458   : > { %2435 = dma.vmem_to_hbm [thread:$0]  (%p2844_p5), %s2232_s20, 1024, %s2234_s11, %s2202_s21, %s2747_s26, %s2747_s26, %s2748_s1  }
 0x459   : > { %s2369_s0 = sshll.u32 %s2827_s17, 7  ;;  %s2214_s21 = sshll.u32 %s4253_s29, 4  ;;  %s2215_s21 = int_to_ptr.vmem [resolvable:$true] %s2214_s21 }
 0x45a   : > { %s2213_s11 = scalar_lea.hbm %s4346_s9, %s2369_s0  ;;  %s2197_s25 = scalar_lea.sflag [#allocation3], %s3926_s22 }
 0x45b   : > { %s2216_s17 = sshll.u32 %s2213_s11, 4  ;;  %s2698_s18 = scalar_lea.hbm %s4346_s9, 256  ;;  %s2217_s17 = int_to_ptr.hbm [resolvable:$true] %s2216_s17 }
 0x45c   : > { %s2692_s27 = sshra.s32 %s2217_s17, 4  ;;  %s2693_s27 = int_to_ptr.hbm [resolvable:$true] %s2692_s27 }
 0x45d   : > { %s2694_s28 = scalar_lea.hbm %s2693_s27, 128  ;;  %p2699_p9 = scmp.lt.s32.totalorder %s2693_s27, %s4346_s9 }
 0x45e   : > { %p2695_p4 = scmp.ne.s32.totalorder %s2693_s27, %s2694_s28  ;;  %p2700_p10 = scmp.lt.s32.totalorder %s2698_s18, %s2694_s28 }
 0x460   : > { %p2696_p7 = pnand %p2695_p4, %p2844_p5  ;;  %p2701_p11 = por %p2700_p10, %p2699_p9 }
 0x462   : > { %p2697_p8 = pneg %p2696_p7 }
 0x464   : > { %p2702_p12 = pnand %p2701_p11, %p2697_p8 }
 0x46f   : > { %v1841_v45 = vpop.xlane.xlu0 %1840 }
 0x470   : > { %2630 = vlog2.f32 %v1841_v45 }
 0x476   : > { %v2631_v0 = vpop.eup %2630 }
 0x477   : > { %v1873_v42 = vmul.f32 0.6931472, %v2631_v0  ;;  %v1843_v12 = vpop.xlane.xlu1 %1842 }
 0x478   : > { %2632 = vlog2.f32 %v1843_v12 }
 0x479   : > { %v1898_v58 = vsub.f32 %v4122_v29, %v1873_v42 }
 0x47b   : > { %1914 = vst [vmem:[%s4253_s29 + $0x30] sm:$0xff] %v1898_v58 }
 0x47e   : > { %v2633_v47 = vpop.eup %2632 }
 0x47f   : > { %v1875_v28 = vmul.f32 0.6931472, %v2633_v47 }
 0x480   : > { %v1845_v3 = vpop.xlane.xlu2 %1844 }
 0x481   : > { %v1899_v14 = vsub.f32 %v4126_v27, %v1875_v28  ;;  %2634 = vlog2.f32 %v1845_v3 }
 0x483   : > { %1915 = vst [vmem:[%s4253_s29 + $0x38] sm:$0xff] %v1899_v14 }
 0x487   : > { %v2635_v24 = vpop.eup %2634 }
 0x488   : > { %v1877_v40 = vmul.f32 0.6931472, %v2635_v24  ;;  %v1847_v39 = vpop.xlane.xlu0 %1846 }
 0x489   : > { %2636 = vlog2.f32 %v1847_v39 }
 0x48a   : > { %v1900_v20 = vsub.f32 %v4130_v10, %v1877_v40 }
 0x48c   : > { %1916 = vst [vmem:[%s4253_s29 + $0x40] sm:$0xff] %v1900_v20 }
 0x48f   : > { %v2637_v50 = vpop.eup %2636 }
 0x490   : > { %v1879_v26 = vmul.f32 0.6931472, %v2637_v50 }
 0x492   : > { %v1901_v21 = vsub.f32 %v4134_v61, %v1879_v26 }
 0x494   : > { %1917 = vst [vmem:[%s4253_s29 + $0x48] sm:$0xff] %v1901_v21 }
 0x498   : > { %v1849_v29 = vpop.xlane.xlu1 %1848 }
 0x499   : > { %2638 = vlog2.f32 %v1849_v29 }
 0x49f   : > { %v2639_v18 = vpop.eup %2638 }
 0x4a0   : > { %v1881_v27 = vmul.f32 0.6931472, %v2639_v18  ;;  %v1853_v13 = vpop.xlane.xlu1 %1852  ;;  %v1851_v5 = vpop.xlane.xlu0 %1850 }
 0x4a1   : > { %2640 = vlog2.f32 %v1853_v13  ;;  %v1855_v23 = vpop.xlane.xlu2 %1854 }
 0x4a2   : > { %v1902_v9 = vsub.f32 %v4141_v11, %v1881_v27  ;;  %2642 = vlog2.f32 %v1855_v23 }
 0x4a3   : > { %2644 = vlog2.f32 %v1851_v5 }
 0x4a4   : > { %1918 = vst [vmem:[%s4253_s29 + $0x50] sm:$0xff] %v1902_v9 }
 0x4a7   : > { %v2641_v10 = vpop.eup %2640 }
 0x4a8   : > { %v2643_v30 = vpop.eup %2642  ;;  %v1885_v61 = vmul.f32 0.6931472, %v2641_v10  ;;  %v1859_v53 = vpop.xlane.xlu1 %1858 }
 0x4a9   : > { %v1857_v44 = vpop.xlane.xlu0 %1856  ;;  %v2645_v15 = vpop.eup %2644  ;;  %v1887_v1 = vmul.f32 0.6931472, %v2643_v30  ;;  %2646 = vlog2.f32 %v1859_v53 }
 0x4aa   : > { %v1904_v52 = vsub.f32 %v4146_v60, %v1885_v61  ;;  %v1883_v31 = vmul.f32 0.6931472, %v2645_v15  ;;  %2648 = vlog2.f32 %v1857_v44 }
 0x4ab   : > { %v1905_v11 = vsub.f32 %v4155_v17, %v1887_v1 }
 0x4ac   : > { %1920 = vst [vmem:[%s4253_s29 + $0x60] sm:$0xff] %v1904_v52  ;;  %v1903_v4 = vsub.f32 %v4152_v32, %v1883_v31 }
 0x4ad   : > { %1921 = vst [vmem:[%s4253_s29 + $0x68] sm:$0xff] %v1905_v11 }
 0x4ae   : > { %1919 = vst [vmem:[%s4253_s29 + $0x58] sm:$0xff] %v1903_v4 }
 0x4af   : > { %v2647_v34 = vpop.eup %2646 }
 0x4b0   : > { %v2649_v60 = vpop.eup %2648  ;;  %v1891_v33 = vmul.f32 0.6931472, %v2647_v34 }
 0x4b1   : > { %v1889_v16 = vmul.f32 0.6931472, %v2649_v60 }
 0x4b2   : > { %v1907_v17 = vsub.f32 %v4162_v6, %v1891_v33 }
 0x4b3   : > { %v1906_v55 = vsub.f32 %v4167_v19, %v1889_v16 }
 0x4b4   : > { %1923 = vst [vmem:[%s4253_s29 + $0x78] sm:$0xff] %v1907_v17 }
 0x4b5   : > { %1922 = vst [vmem:[%s4253_s29 + $0x70] sm:$0xff] %v1906_v55 }
 0x4b6   : > { %2705 = shalt.err (!%p2702_p12)
}
 0x4b7   : > { %s2749_s22 = smov 128   ;;  %s2750_s29 = smov 8  }
 0x4b8   : > { %2434 = dma.vmem_to_hbm [thread:$0]  (%p2844_p5), %s2215_s21, 2048, %s2217_s17, %s2197_s25, %s2749_s22, %s2749_s22, %s2750_s29  }
 0x4b9 PF: > { %p2445_p13 = scmp.ge.s32.totalorder %s2744_s16, 2  ;;  %s2248_s1 = sand.u32 1, %s2732_s13  }
 0x4ba   : > { %s2249_s20 = scalar_lea.sflag [#allocation3], %s2248_s1 }
 0x4bb   : > { %p2439_p0 = pnand %p2445_p13, %p2848_p6 }
 0x4bd   : > { %p2440_p1 = pneg %p2439_p0 }
 0x4bf   : > { %2723 = dma.done.wait (%p2440_p1), %s2249_s20, 2048  }
 0x4c0   : > { %2725 = vsyncadd (%p2440_p1), %s2249_s20, 4294965248  ;;  %s2259_s11 = scalar_lea.sflag [#allocation5], %s2248_s1 }
 0x4c1   : > { %2727 = dma.done.wait (%p2440_p1), %s2259_s11, 1024  }
 0x4c2   : > { %2729 = vsyncadd (%p2440_p1), %s2259_s11, 4294966272  ;;  %s4377_s23 = sld [smem:[#allocation8_spill]]  ;;  %p24_p5 = scmp.ge.s32.totalorder %s2831_s19, 4  }
 0x4c3   : > { %s4378_s13 = smov %s2736_s14  ;;  %s4379_s14 = smov %s2740_s15 }
 0x4c4   : > { %s4381_s16 = smov %s2831_s19  ;;  %26 = sbr.rel (!%p24_p5) target bundleno = 8 (0x8), region = 108 }
 0x4c8   : > { %s4380_s15 = smov %s4377_s23 }
 0x4c9   :  { %2265 = vsyncpa [#allocation3], 1 }
 0x4ca   :  { %2267 = vsyncpa [#allocation3 + $0x1], 1 }
 0x4cb   :  { %2268 = vsyncpa [#allocation5], 1 }
 0x4cc   :  { %2270 = vsyncpa [#allocation5 + $0x1], 1 }

</bundles_post_ra>
